<compile_context>
chip_gen: v7x
topology: tpu7x:2x2x1
jax: 0.10.0
libtpu: 0.0.40
codegen_flags: <defaults>
</compile_context>

<pallas_src>
import functools

import jax
import jax.numpy as jnp
from jax.experimental import pallas as pl
from jax.experimental.pallas import tpu as pltpu


def _softmax_last(v):
    """Numerically stable softmax over the last axis (exact normalisation)."""
    m = jnp.max(v, axis=-1, keepdims=True)
    e = jnp.exp(v - m)
    return e / jnp.sum(e, axis=-1, keepdims=True)


def _stm_kernel(x_ref, wt_ref, ws_ref, o_ref, *, scale, cb, F, T, flat):
    # x_ref : (B, cb, F, T)  [natural]   or  (B, cb, F*T)  [flat, T < 128]
    # wt_ref: (cb, 1, T)     W_temp[c, :, 0] transposed -> broadcasts over F
    # ws_ref: (cb, F, 1)     W_spec[c, 0, :] transposed -> broadcasts over T
    wt = wt_ref[...].astype(jnp.float32)                      # (cb, 1, T)
    ws = ws_ref[...].astype(jnp.float32)                      # (cb, F, 1)

    if flat:
        # One relayout of the lane-dense flat slab into the (F, T) view used
        # by the two weighted reductions; bound once on purpose (re-reading
        # the ref would pay the relayout twice).  The flat slab itself is
        # re-read below for the lane-dense scale + store (VMEM reloads are
        # cheap: 3 vld/cycle).
        xf = x_ref[...].astype(jnp.float32)                   # (B, cb, F*T)
        x_nat = xf.reshape(xf.shape[0], cb, F, T)
        x_t = x_nat
        x_s = x_nat
    else:
        # Index per use: the (potential) upcast is fused into each pass rather
        # than materialising an f32 copy of the whole slab.
        x_t = x_ref[...].astype(jnp.float32)                  # (B, cb, F, T)
        x_s = x_ref[...].astype(jnp.float32)

    # X_temp[b,c,f] = sum_t x * W_temp   (lane reduce);  softmax over F.
    x_temp = jnp.sum(x_t * wt[None], axis=-1)                 # (B, cb, F)
    a_temp = _softmax_last(x_temp)

    # X_spec[b,c,t] = sum_f x * W_spec   (sublane reduce);  softmax over T.
    x_spec = jnp.sum(x_s * ws[None], axis=2)                  # (B, cb, T)
    a_spec = _softmax_last(x_spec)

    # A_mask[c,f,t] = sum_b A_temp[b,c,f] * A_spec[b,c,t]: a single batched
    # MXU contraction (c = batch dim, b = contracting dim) - no per-channel
    # loop, no per-channel strided stores.  Fold the scalar S into the small
    # (cb, F, T) mask, not the (B, cb, F, T) slab.
    mask = jnp.einsum('bcf,bct->cft', a_temp, a_spec,
                      preferred_element_type=jnp.float32) * scale   # (cb,F,T)
    if flat:
        mask = mask.reshape(cb, F * T)                        # tiny relayout

    # Single full-block store (lane-dense in the flat path).
    o_ref[...] = (x_ref[...].astype(jnp.float32) * mask[None]).astype(o_ref.dtype)


def _tpu_generation_defaults():
    """(target_block_bytes, vmem_budget, min_grid_steps) per TPU generation.

    Falls back to safe values when the backend is not a TPU (e.g. the CPU
    interpreter), where vmem_limit_bytes is ignored anyway.
    """
    try:
        kind = jax.devices()[0].device_kind.lower()
    except Exception:  # pragma: no cover - defensive
        kind = ""
    if "v7" in kind:
        # v7x: only 64 MiB physical VMEM per TensorCore and 2 TensorCores per
        # chip -> keep headroom and require >=4 grid steps so each core still
        # double-buffers its block DMA.
        return (3 << 20), (36 << 20), 4
    # v5e / v6e have 128 MiB VMEM: larger blocks amortise the ~0.35us/step
    # overhead and DMA ramp; >=2 steps keeps the pipeline overlapped.
    return (8 << 20), (64 << 20), 2


def _pick_channels_per_block(B, C, F, T, itemsize, *, flat,
                             target_block_bytes, vmem_budget, min_steps):
    """Largest channel-divisor whose slab fits the block target and whose
    in+out double-buffered footprint fits the VMEM budget.

    Preference order: sublane-dense block in the flat path (cb % 8 == 0 or
    cb == C), then >= min_steps grid steps, then block size.
    """
    per_ch = max(1, B * F * T * itemsize)
    divisors = [d for d in range(1, C + 1) if C % d == 0]

    def vmem_need(d):
        # in + out blocks, double-buffered by the pipeline, + weights & slack.
        return 4 * d * per_ch + (2 << 20)

    fits = [d for d in divisors
            if d * per_ch <= target_block_bytes and vmem_need(d) <= vmem_budget]
    if not fits:
        fits = [1]   # TODO(synk): tile T as well if one channel overflows VMEM.

    def rank(d):
        lane_ok = (not flat) or (d % 8 == 0) or (d == C)
        depth_ok = (C // d) >= min_steps
        return (lane_ok, depth_ok, d)

    return max(fits, key=rank)


def spectro_temporal_mask(x, w_temp, w_spec, S=100.0):
    """x: (B, C, F, T); w_temp: (C, T, 1); w_spec: (C, 1, F) -> (B, C, F, T)."""
    B, C, F_, T = x.shape
    assert w_temp.shape == (C, T, 1)
    assert w_spec.shape == (C, 1, F_)

    # Tiny parameter transposes in the wrapper so the kernel needs no weight
    # relayout: (C,1,T) broadcasts over F, (C,F,1) broadcasts over T.
    wt = jnp.transpose(w_temp, (0, 2, 1))          # (C, 1, T)
    ws = jnp.transpose(w_spec, (0, 2, 1))          # (C, F, 1)

    itemsize = jnp.dtype(x.dtype).itemsize
    target_block, vmem_budget, min_steps = _tpu_generation_defaults()

    # T < 128 guard: use the lane-dense flattened layout when possible.
    flat = T < 128
    cb = _pick_channels_per_block(B, C, F_, T, itemsize, flat=flat,
                                  target_block_bytes=target_block,
                                  vmem_budget=vmem_budget, min_steps=min_steps)
    if flat and not (cb % 8 == 0 or cb == C):
        flat = False
        cb = _pick_channels_per_block(B, C, F_, T, itemsize, flat=False,
                                      target_block_bytes=target_block,
                                      vmem_budget=vmem_budget,
                                      min_steps=min_steps)

    grid = (C // cb,)
    block_bytes = B * cb * F_ * T * itemsize
    need = 4 * block_bytes + (2 << 20)
    # Never under-provision: cb was already clamped to the budget, so this
    # stays within the per-generation budget except in the single-channel
    # fallback, where a too-small limit would only hide the problem.
    vmem_limit = int(max(need, min(32 << 20, vmem_budget)))

    if flat:
        x_in = x.reshape(B, C, F_ * T)             # free: trailing dims merge
        x_bspec = pl.BlockSpec((B, cb, F_ * T), lambda i: (0, i, 0))
        out_spec = pl.BlockSpec((B, cb, F_ * T), lambda i: (0, i, 0))
        out_shape = jax.ShapeDtypeStruct((B, C, F_ * T), x.dtype)
    else:
        x_in = x
        x_bspec = pl.BlockSpec((B, cb, F_, T), lambda i: (0, i, 0, 0))
        out_spec = pl.BlockSpec((B, cb, F_, T), lambda i: (0, i, 0, 0))
        out_shape = jax.ShapeDtypeStruct((B, C, F_, T), x.dtype)

    # Memory-bound kernel (~0.6 flop/byte).
    cost = pl.CostEstimate(
        flops=6 * B * C * F_ * T,
        transcendentals=B * C * (F_ + T),
        bytes_accessed=(2 * B * C * F_ * T + C * (F_ + T)) * itemsize)

    kernel = functools.partial(_stm_kernel, scale=float(S), cb=cb,
                               F=F_, T=T, flat=flat)
    out = pl.pallas_call(
        kernel,
        out_shape=out_shape,
        grid_spec=pltpu.PrefetchScalarGridSpec(
            num_scalar_prefetch=0,
            grid=grid,
            in_specs=[
                x_bspec,
                pl.BlockSpec((cb, 1, T), lambda i: (i, 0, 0)),
                pl.BlockSpec((cb, F_, 1), lambda i: (i, 0, 0)),
            ],
            out_specs=out_spec,
        ),
        compiler_params=pltpu.CompilerParams(
            dimension_semantics=("parallel",),
            vmem_limit_bytes=vmem_limit),
        cost_estimate=cost,
    )(x_in, wt, ws)

    return out.reshape(B, C, F_, T) if flat else out


def ref_forward(x, w_temp, w_spec, S):
    """Pure-JAX reference of the PyTorch forward (for correctness checks)."""
    wt = w_temp[:, :, 0]                                    # (C, T)
    ws = w_spec[:, 0, :]                                    # (C, F)
    x_temp = jnp.einsum('bcft,ct->bcf', x, wt)
    a_temp = jax.nn.softmax(x_temp, axis=2)
    x_spec = jnp.einsum('bcft,cf->bct', x, ws)
    a_spec = jax.nn.softmax(x_spec, axis=2)
    a_mask = jnp.einsum('bcf,bct->cft', a_temp, a_spec)     # batch dims summed
    return a_mask[None, :, :, :] * x * S


if __name__ == "__main__":
    S = 100.0
    key = jax.random.PRNGKey(0)
    kx, kt, ks, kx2 = jax.random.split(key, 4)

    # Small-T shape consistent with the module (exercises the flat path).
    B, C, F_, T = 2, 4, 16, 16
    x = jax.random.normal(kx, (B, C, F_, T), dtype=jnp.float32)

    # Case 1: the module's __init__ parameters (torch.ones).
    w_temp = jnp.ones((C, T, 1), dtype=jnp.float32)
    w_spec = jnp.ones((C, 1, F_), dtype=jnp.float32)
    out = jax.block_until_ready(spectro_temporal_mask(x, w_temp, w_spec, S))
    ref = ref_forward(x, w_temp, w_spec, S)
    assert out.shape == (B, C, F_, T)
    assert jnp.allclose(out, ref, atol=3e-3, rtol=3e-3), "kernel != reference (ones)"

    # Case 2: random weights (checks both reduction/softmax axes).
    w_temp_r = jax.random.normal(kt, (C, T, 1), dtype=jnp.float32)
    w_spec_r = jax.random.normal(ks, (C, 1, F_), dtype=jnp.float32)
    out_r = jax.block_until_ready(spectro_temporal_mask(x, w_temp_r, w_spec_r, S))
    ref_r = ref_forward(x, w_temp_r, w_spec_r, S)
    assert jnp.allclose(out_r, ref_r, atol=3e-3, rtol=3e-3), "kernel != reference (rand)"

    # Case 3: T = 128 exercises the natural (already lane-dense) path.
    T2 = 128
    x2 = jax.random.normal(kx2, (B, C, F_, T2), dtype=jnp.float32)
    w_temp2 = jax.random.normal(kt, (C, T2, 1), dtype=jnp.float32)
    w_spec2 = jax.random.normal(ks, (C, 1, F_), dtype=jnp.float32)
    out2 = jax.block_until_ready(spectro_temporal_mask(x2, w_temp2, w_spec2, S))
    ref2 = ref_forward(x2, w_temp2, w_spec2, S)
    assert jnp.allclose(out2, ref2, atol=3e-3, rtol=3e-3), "kernel != reference (T=128)"

    print("KERNEL_OK")
</pallas_src>

<mosaic_0001>
module attributes {stable_mosaic.version = 11 : i64} {
  func.func @_stm_kernel(%arg0: i32, %arg1: memref<2x4x256xf32, #tpu.memory_space<vmem>>, %arg2: memref<4x1x16xf32, #tpu.memory_space<vmem>>, %arg3: memref<4x16x1xf32, #tpu.memory_space<vmem>>, %arg4: memref<2x4x256xf32, #tpu.memory_space<vmem>>) attributes {dimension_semantics = [#tpu.dimension_semantics<parallel>], iteration_bounds = array<i64: 1>, scalar_prefetch = 0 : i64, scratch_operands = 0 : i64, tpu.core_type = #tpu.core_type<tc>, window_params = [{transform_indices = @transform_0, window_bounds = array<i64: 2, 4, 256>}, {transform_indices = @transform_1, window_bounds = array<i64: 4, 1, 16>}, {transform_indices = @transform_2, window_bounds = array<i64: 4, 16, 1>}, {transform_indices = @transform_3, window_bounds = array<i64: 2, 4, 256>}]} {
    %c0 = arith.constant 0 : index
    %c0_0 = arith.constant 0 : index
    %c0_1 = arith.constant 0 : index
    %0 = vector.load %arg2[%c0, %c0_0, %c0_1] : memref<4x1x16xf32, #tpu.memory_space<vmem>>, vector<4x1x16xf32>
    %c0_2 = arith.constant 0 : index
    %c0_3 = arith.constant 0 : index
    %c0_4 = arith.constant 0 : index
    %1 = vector.load %arg3[%c0_2, %c0_3, %c0_4] : memref<4x16x1xf32, #tpu.memory_space<vmem>>, vector<4x16x1xf32>
    %c0_5 = arith.constant 0 : index
    %c0_6 = arith.constant 0 : index
    %c0_7 = arith.constant 0 : index
    %2 = vector.load %arg1[%c0_5, %c0_6, %c0_7] : memref<2x4x256xf32, #tpu.memory_space<vmem>>, vector<2x4x256xf32>
    %3 = vector.shape_cast %2 : vector<2x4x256xf32> to vector<2x4x16x16xf32>
    %4 = vector.shape_cast %0 : vector<4x1x16xf32> to vector<1x4x1x16xf32>
    %5 = vector.broadcast %4 : vector<1x4x1x16xf32> to vector<2x4x16x16xf32>
    %6 = arith.mulf %3, %5 : vector<2x4x16x16xf32>
    %cst = arith.constant dense<0.000000e+00> : vector<2x4x16xf32>
    %7 = vector.multi_reduction <add>, %6, %cst [3] : vector<2x4x16x16xf32> to vector<2x4x16xf32>
    %cst_8 = arith.constant dense<0xFF800000> : vector<2x4xf32>
    %8 = vector.multi_reduction <maximumf>, %7, %cst_8 [2] : vector<2x4x16xf32> to vector<2x4xf32>
    %9 = vector.shape_cast %8 : vector<2x4xf32> to vector<2x4x1xf32>
    %10 = vector.broadcast %9 : vector<2x4x1xf32> to vector<2x4x16xf32>
    %11 = arith.subf %7, %10 : vector<2x4x16xf32>
    %12 = math.exp %11 : vector<2x4x16xf32>
    %cst_9 = arith.constant dense<0.000000e+00> : vector<2x4xf32>
    %13 = vector.multi_reduction <add>, %12, %cst_9 [2] : vector<2x4x16xf32> to vector<2x4xf32>
    %14 = vector.shape_cast %13 : vector<2x4xf32> to vector<2x4x1xf32>
    %15 = vector.broadcast %14 : vector<2x4x1xf32> to vector<2x4x16xf32>
    %16 = arith.divf %12, %15 : vector<2x4x16xf32>
    %17 = vector.shape_cast %1 : vector<4x16x1xf32> to vector<1x4x16x1xf32>
    %18 = vector.broadcast %17 : vector<1x4x16x1xf32> to vector<2x4x16x16xf32>
    %19 = arith.mulf %3, %18 : vector<2x4x16x16xf32>
    %cst_10 = arith.constant dense<0.000000e+00> : vector<2x4x16xf32>
    %20 = vector.multi_reduction <add>, %19, %cst_10 [2] : vector<2x4x16x16xf32> to vector<2x4x16xf32>
    %cst_11 = arith.constant dense<0xFF800000> : vector<2x4xf32>
    %21 = vector.multi_reduction <maximumf>, %20, %cst_11 [2] : vector<2x4x16xf32> to vector<2x4xf32>
    %22 = vector.shape_cast %21 : vector<2x4xf32> to vector<2x4x1xf32>
    %23 = vector.broadcast %22 : vector<2x4x1xf32> to vector<2x4x16xf32>
    %24 = arith.subf %20, %23 : vector<2x4x16xf32>
    %25 = math.exp %24 : vector<2x4x16xf32>
    %cst_12 = arith.constant dense<0.000000e+00> : vector<2x4xf32>
    %26 = vector.multi_reduction <add>, %25, %cst_12 [2] : vector<2x4x16xf32> to vector<2x4xf32>
    %27 = vector.shape_cast %26 : vector<2x4xf32> to vector<2x4x1xf32>
    %28 = vector.broadcast %27 : vector<2x4x1xf32> to vector<2x4x16xf32>
    %29 = arith.divf %25, %28 : vector<2x4x16xf32>
    "tpu.trace_start"() <{level = 10 : i32, message = "bcf,bct->cft"}> : () -> ()
    %cst_13 = arith.constant dense<0.000000e+00> : vector<4x16x16xf32>
    %30 = tpu.matmul %16, %29, %cst_13 {dimension_numbers = #tpu.dot_dimension_numbers<[0], [0], [2], [2], [0, 1, 0, 2, 1, 2], [1], [1]>} : vector<2x4x16xf32>, vector<2x4x16xf32>, vector<4x16x16xf32> -> vector<4x16x16xf32>
    "tpu.trace_stop"() : () -> ()
    %cst_14 = arith.constant 1.000000e+02 : f32
    %31 = vector.broadcast %cst_14 : f32 to vector<4x16x16xf32>
    %32 = arith.mulf %30, %31 : vector<4x16x16xf32>
    %33 = vector.shape_cast %32 : vector<4x16x16xf32> to vector<4x256xf32>
    %c0_15 = arith.constant 0 : index
    %c0_16 = arith.constant 0 : index
    %c0_17 = arith.constant 0 : index
    %34 = vector.load %arg1[%c0_15, %c0_16, %c0_17] : memref<2x4x256xf32, #tpu.memory_space<vmem>>, vector<2x4x256xf32>
    %35 = vector.shape_cast %33 : vector<4x256xf32> to vector<1x4x256xf32>
    %36 = vector.broadcast %35 : vector<1x4x256xf32> to vector<2x4x256xf32>
    %37 = arith.mulf %34, %36 : vector<2x4x256xf32>
    %c0_18 = arith.constant 0 : index
    %c0_19 = arith.constant 0 : index
    %c0_20 = arith.constant 0 : index
    %38 = vector.load %arg4[%c0_18, %c0_19, %c0_20] : memref<2x4x256xf32, #tpu.memory_space<vmem>>, vector<2x4x256xf32>
    tpu.vector_store %arg4[%c0_18, %c0_19, %c0_20], %37 {strides = array<i32>} : memref<2x4x256xf32, #tpu.memory_space<vmem>>, vector<2x4x256xf32>,
    return
  }
  func.func @transform_0(%arg0: i32) -> (i32, i32, i32) {
    %c0_i32 = arith.constant 0 : i32
    %c0_i32_0 = arith.constant 0 : i32
    %c0_i32_1 = arith.constant 0 : i32
    return %c0_i32, %arg0, %c0_i32_0 : i32, i32, i32
  }
  func.func @transform_1(%arg0: i32) -> (i32, i32, i32) {
    %c0_i32 = arith.constant 0 : i32
    %c0_i32_0 = arith.constant 0 : i32
    %c0_i32_1 = arith.constant 0 : i32
    return %arg0, %c0_i32, %c0_i32_0 : i32, i32, i32
  }
  func.func @transform_2(%arg0: i32) -> (i32, i32, i32) {
    %c0_i32 = arith.constant 0 : i32
    %c0_i32_0 = arith.constant 0 : i32
    %c0_i32_1 = arith.constant 0 : i32
    return %arg0, %c0_i32, %c0_i32_0 : i32, i32, i32
  }
  func.func @transform_3(%arg0: i32) -> (i32, i32, i32) {
    %c0_i32 = arith.constant 0 : i32
    %c0_i32_0 = arith.constant 0 : i32
    %c0_i32_1 = arith.constant 0 : i32
    return %c0_i32, %arg0, %c0_i32_0 : i32, i32, i32
  }
}

</mosaic_0001>

<bundles_post_ra>
// kernel: tpu_custom_call.1
= control target key start
LH: loop header
LB: loop body
LE: loop exit
PB: predicated region body
PF: predicated region fallthrough
CT: control target
= control target key end

     0   :  { %s3216_s14 = smov 96   ;;  %s3217_s15 = smov 112   ;;  %s4129_s0 = inlined_call_operand.vmem [shape: f32[2,4,256], index: 0, kind: input, shape index: {}]   ;;  %s4130_s1 = inlined_call_operand.vmem [shape: f32[4,1,16], index: 1, kind: input, shape index: {}]   ;;  %s4131_s2 = inlined_call_operand.vmem [shape: f32[4,16,1], index: 2, kind: input, shape index: {}]   ;;  %s4132_s3 = inlined_call_operand.hbm [shape: f32[2,4,256], index: 3, kind: output, shape index: {}]  }
   0x1   :  { %v3255_v0 = vld [vmem:[%s4129_s0] sm:$0xff]  ;;  %v28_v1 = vld [vmem:[%s4129_s0 + $0x8] sm:$0xff] }
   0x2   :  { %43 = vrot.lane.b32.xlu1 %v3255_v0, %s3216_s14  ;;  %35 = vrot.lane.b32.xlu0 %v3255_v0, %s3217_s15 }
   0x3   :  { %8 = vsyncpa [#allocation3], 0  ;;  %s3218_s18 = smov 80   ;;  %s3219_s19 = smov 64   ;;  %v3223_v6 = vmov 1983009808   ;;  %v109_v8 = vlaneseq }
   0x4   :  { %s3220_s20 = smov 48   ;;  %s3221_s21 = smov 32   ;;  %v107_v7 = vunpack.c.l.s4 %v3223_v6  ;;  %v3224_v13 = vmov 1934713408   ;;  %v32_v15 = vrot.slane %v28_v1, 4  ;;  %v31_v21 = vrot.slane %v3255_v0, 4 }
   0x5   :  { %s3222_s22 = smov 16   ;;  %v3282_v12 = vshrl.u32 %v109_v8, 7  ;;  %v124_v14 = vunpack.c.l.s4 %v3224_v13  ;;  %v3301_v40 = vld [vmem:[%s4130_s1] ss:$0 sm:$0xff]  ;;  %v3323_v49 = vld [vmem:[%s4130_s1 + $0x2] ss:$0 sm:$0xff] }
   0x6   :  { %45 = vrot.lane.b32.xlu1 %v28_v1, %s3216_s14  ;;  %37 = vrot.lane.b32.xlu0 %v28_v1, %s3217_s15  ;;  %v108_v11 = vunpack.c.0.s8 %v107_v7  ;;  %v3308_v42 = vcombine.high %v3301_v40, %v3301_v40  ;;  %v3328_v50 = vld [vmem:[%s4130_s1 + $0x1] ss:$0 sm:$0xff]  ;;  %v3335_v53 = vcombine.high %v3323_v49, %v3323_v49  ;;  %vm505_vm0 = vcmask 130048  }
   0x7   :  { %v125_v29 = vunpack.c.0.s8 %v124_v14  ;;  %v3339_v54 = vcombine.high %v3328_v50, %v3328_v50  ;;  %vm581_vm1 = vcmask 130112   ;;  %vm646_vm2 = vcmask 1041409  }
   0x8   :  { %v3288_v28 = vsub.s32 %v108_v11, %v3282_v12  ;;  %vm648_vm3 = vcmask 1042434   ;;  %vm650_vm4 = vcmask 1043459   ;;  %vm657_vm5 = vcmask 125952  }
   0x9   :  { %v3304_v41 = vsub.s32 %v125_v29, %v3282_v12  ;;  %vm2469_vm6 = vcmask 1041408   ;;  %vm2462_vm7 = vcmask 15360   ;;  %vm3001_vm8 = vcmask 261120  }
   0xa   :  { %53 = vrot.lane.b32.xlu1 %v28_v1, %s3218_s18  ;;  %51 = vrot.lane.b32.xlu0 %v3255_v0, %s3218_s18  ;;  %4159 = vst [vmem:[#allocation5_spill] sm:$0xff] %v3288_v28  ;;  %vm3003_vm9 = vcmask 392192   ;;  %vm3005_vm10 = vcmask 523264   ;;  %vm3007_vm11 = vcmask 654336   ;;  %vm3009_vm12 = vcmask 785408  }
   0xb   :  { %4160 = vst [vmem:[#allocation6_spill] sm:$0xff] %v3304_v41  ;;  %vm3011_vm13 = vcmask 916480  }
   0xe   :  { %61 = vrot.lane.b32.xlu1 %v28_v1, %s3219_s19  ;;  %59 = vrot.lane.b32.xlu0 %v3255_v0, %s3219_s19 }
  0x12   :  { %69 = vrot.lane.b32.xlu1 %v28_v1, %s3220_s20  ;;  %67 = vrot.lane.b32.xlu0 %v3255_v0, %s3220_s20 }
  0x16   :  { %77 = vrot.lane.b32.xlu1 %v28_v1, %s3221_s21  ;;  %75 = vrot.lane.b32.xlu0 %v3255_v0, %s3221_s21 }
  0x1a   :  { %85 = vrot.lane.b32.xlu1 %v28_v1, %s3222_s22  ;;  %83 = vrot.lane.b32.xlu0 %v3255_v0, %s3222_s22 }
  0x74   :  { %v44_v2 = vpop.permute.xlu1 %43  ;;  %v36_v3 = vpop.permute.xlu0 %35 }
  0x75   :  { %v47_v22 = vrot.slane %v44_v2, 4  ;;  %v39_v23 = vrot.slane %v36_v3, 4  ;;  %v105_v30 = vcombine.low %v3255_v0, %v44_v2 }
  0x77   :  { %v173_v36 = vcombine.low %v31_v21, %v47_v22  ;;  %v112_v43 = vrot.slane %v105_v30, %v3288_v28 }
  0x78   :  { %v46_v4 = vpop.permute.xlu1 %45  ;;  %v38_v5 = vpop.permute.xlu0 %37 }
  0x79   :  { %v48_v16 = vrot.slane %v46_v4, 4  ;;  %v241_v24 = vcombine.low %v28_v1, %v46_v4  ;;  %v40_v25 = vrot.slane %v38_v5, 4  ;;  %v3331_v51 = vrot.slane %v173_v36, %v3288_v28 }
  0x7b   :  { %v309_v31 = vcombine.low %v32_v15, %v48_v16  ;;  %v3292_v37 = vrot.slane %v241_v24, %v3288_v28 }
  0x7c   :  { %v54_v9 = vpop.permute.xlu1 %53  ;;  %v52_v10 = vpop.permute.xlu0 %51 }
  0x7d   :  { %v56_v17 = vrot.slane %v54_v9, 4  ;;  %v55_v18 = vrot.slane %v52_v10, 4  ;;  %v249_v26 = vcombine.low %v38_v5, %v54_v9  ;;  %v113_v27 = vcombine.low %v36_v3, %v52_v10 }
  0x7e   :  { %v3312_v44 = vrot.slane %v309_v31, %v3288_v28 }
  0x7f   :  { %v317_v32 = vcombine.low %v40_v25, %v56_v17  ;;  %v181_v33 = vcombine.low %v39_v23, %v55_v18  ;;  %v3295_v38 = vrot.slane %v249_v26, %v3288_v28  ;;  %v120_v39 = vrot.slane %v113_v27, %v3288_v28 }
  0x80   :  { %v62_v19 = vpop.permute.xlu1 %61  ;;  %v3284_v20 = vpop.permute.xlu0 %59 }
  0x81   :  { %v3315_v45 = vrot.slane %v317_v32, %v3288_v28  ;;  %v3318_v46 = vrot.slane %v181_v33, %v3288_v28  ;;  %v257_v55 = vcombine.low %v3292_v37, %v3295_v38  ;;  %v258_v56 = vcombine.high %v3292_v37, %v3295_v38 }
  0x82   :  { %v121_v57 = vcombine.low %v112_v43, %v120_v39  ;;  %v122_v58 = vcombine.high %v112_v43, %v120_v39  ;;  %v64_v59 = vrot.slane %v62_v19, 4  ;;  %v63_v60 = vrot.slane %v3284_v20, 4 }
  0x83   :  { %v325_v63 = vcombine.low %v3312_v44, %v3315_v45  ;;  %v189_v0 = vcombine.low %v3331_v51, %v3318_v46  ;;  %v190_v1 = vcombine.high %v3331_v51, %v3318_v46  ;;  %v3354_v14 = vrot.slane %v257_v55, %v3304_v41 }
  0x84   :  { %v70_v34 = vpop.permute.xlu1 %69  ;;  %v68_v35 = vpop.permute.xlu0 %67  ;;  %v3361_v22 = vrot.slane %v121_v57, %v3304_v41  ;;  %v3367_v31 = vrot.slane %v122_v58, %v3304_v41  ;;  %v4133_v39 = vmov 0.0  }
  0x85   :  { %v72_v5 = vrot.slane %v70_v34, 4  ;;  %v71_v10 = vrot.slane %v68_v35, 4 }
  0x86   :  { %v409_v38 = vmul.f32 %v3301_v40, %v3361_v22  ;;  %v3385_v43 = vcombine.high %v3361_v22, %v4133_v39 }
  0x88   :  { %v78_v47 = vpop.permute.xlu1 %77  ;;  %v76_v48 = vpop.permute.xlu0 %75 }
  0x89   :  { %v80_v52 = vrot.slane %v78_v47, 4  ;;  %v275_v61 = vcombine.low %v62_v19, %v78_v47  ;;  %v79_v62 = vrot.slane %v76_v48, 4  ;;  %v139_v2 = vcombine.low %v3284_v20, %v76_v48 }
  0x8b   :  { %v343_v6 = vcombine.low %v64_v59, %v80_v52  ;;  %v282_v15 = vrot.slane %v275_v61, %v3288_v28  ;;  %v207_v16 = vcombine.low %v63_v60, %v79_v62  ;;  %v146_v19 = vrot.slane %v139_v2, %v3288_v28 }
  0x8c   :  { %v86_v3 = vpop.permute.xlu1 %85  ;;  %v84_v4 = vpop.permute.xlu0 %83  ;;  %v417_v62 = vmul.f32 %v3323_v49, %v3367_v31  ;;  %v3406_v2 = vrot.slane %v258_v56, %v3304_v41 }
  0x8d   :  { %v88_v7 = vrot.slane %v86_v3, 4  ;;  %v283_v9 = vcombine.low %v70_v34, %v86_v3  ;;  %v87_v11 = vrot.slane %v84_v4, 4  ;;  %v147_v13 = vcombine.low %v68_v35, %v84_v4 }
  0x8e   :  { %v350_v23 = vrot.slane %v343_v6, %v3288_v28  ;;  %v214_v32 = vrot.slane %v207_v16, %v3288_v28  ;;  %v425_v35 = vmul.f32 %v3301_v40, %v3354_v14  ;;  %v3409_v3 = vrot.slane %v325_v63, %v3304_v41 }
  0x8f   :  { %v290_v17 = vrot.slane %v283_v9, %v3288_v28  ;;  %v351_v18 = vcombine.low %v72_v5, %v88_v7  ;;  %v154_v20 = vrot.slane %v147_v13, %v3288_v28  ;;  %v215_v21 = vcombine.low %v71_v10, %v87_v11 }
  0x90   :  { %v413_v6 = vmul.f32 %v3328_v50, %v3385_v43 }
  0x91   :  { %v291_v24 = vcombine.low %v282_v15, %v290_v17  ;;  %v292_v25 = vcombine.high %v282_v15, %v290_v17  ;;  %v358_v26 = vrot.slane %v351_v18, %v3288_v28  ;;  %v155_v27 = vcombine.low %v146_v19, %v154_v20 }
  0x92   :  { %v156_v29 = vcombine.high %v146_v19, %v154_v20  ;;  %v222_v30 = vrot.slane %v215_v21, %v3288_v28  ;;  %v433_v17 = vmul.f32 %v3323_v49, %v3406_v2  ;;  %v3433_v18 = vrot.slane %v189_v0, %v3304_v41 }
  0x93   :  { %v359_v33 = vcombine.low %v350_v23, %v358_v26  ;;  %v3371_v34 = vrot.slane %v291_v24, %v3304_v41  ;;  %v3376_v36 = vrot.slane %v155_v27, %v3304_v41  ;;  %v3390_v55 = vrot.slane %v292_v25, %v3304_v41 }
  0x94   :  { %v3379_v37 = vrot.slane %v156_v29, %v3304_v41  ;;  %v223_v47 = vcombine.low %v214_v32, %v222_v30  ;;  %v224_v48 = vcombine.high %v214_v32, %v222_v30  ;;  %v360_v4 = vcombine.high %v350_v23, %v358_v26 }
  0x95   :  { %v426_v52 = vmul.f32 %v3308_v42, %v3371_v34  ;;  %v410_v57 = vmul.f32 %v3308_v42, %v3376_v36  ;;  %v3398_v59 = vcombine.high %v3376_v36, %v4133_v39  ;;  %v3401_v60 = vrot.slane %v359_v33, %v3304_v41 }
  0x96   :  { %v418_v58 = vmul.f32 %v3335_v53, %v3379_v37  ;;  %v434_v11 = vmul.f32 %v3335_v53, %v3390_v55  ;;  %v3419_v56 = vrot.slane %v223_v47, %v3304_v41  ;;  %v3425_v16 = vrot.slane %v224_v48, %v3304_v41 }
  0x97   :  { %v481_v61 = vcombine.low %v425_v35, %v426_v52  ;;  %v473_v5 = vcombine.low %v409_v38, %v410_v57  ;;  %v414_v7 = vmul.f32 %v3339_v54, %v3398_v59  ;;  %v428_v15 = vmul.f32 %v3308_v42, %v3401_v60 }
  0x98   :  { %v477_v10 = vcombine.low %v417_v62, %v418_v58  ;;  %v326_v19 = vcombine.high %v3312_v44, %v3315_v45  ;;  %v427_v20 = vmul.f32 %v3301_v40, %v3409_v3  ;;  %v3443_v21 = vrot.slane %v190_v1, %v3304_v41  ;;  %v3049_v1 = vld [vmem:[%s4130_s1 + $0x3] ss:$0 sm:$0xff] }
  0x99   :  { %v530_v9 = vsel %vm505_vm0, %v481_v61, 0.0  ;;  %v506_v63 = vsel %vm505_vm0, %v473_v5, 0.0  ;;  %v475_v13 = vcombine.low %v413_v6, %v414_v7  ;;  %v485_v24 = vcombine.low %v433_v17, %v434_v11 }
  0x9a   :  { %531 = vadd.xlane.f32.xlu1 %v530_v9  ;;  %507 = vadd.xlane.f32.xlu0 %v506_v63  ;;  %v518_v23 = vsel %vm505_vm0, %v477_v10, 0.0  ;;  %v412_v25 = vmul.f32 %v3308_v42, %v3419_v56  ;;  %v3450_v0 = vcombine.high %v3371_v34, %v4133_v39  ;;  %v482_v45 = vcombine.low %v427_v20, %v428_v15 }
  0x9b   :  { %v512_v44 = vsel %vm505_vm0, %v475_v13, 0.0  ;;  %v420_v26 = vmul.f32 %v3335_v53, %v3425_v16  ;;  %v3456_v46 = vrot.slane %v360_v4, %v3304_v41  ;;  %v411_v51 = vmul.f32 %v3301_v40, %v3433_v18 }
  0x9c   :  { %v3462_v42 = vcombine.high %v3354_v14, %v4133_v39  ;;  %v419_v27 = vmul.f32 %v3323_v49, %v3443_v21  ;;  %v3470_v29 = vrot.slane %v326_v19, %v3304_v41  ;;  %v404_v30 = vcombine.high %v3049_v1, %v3049_v1 }
  0x9d   :  { %v542_v32 = vsel %vm505_vm0, %v485_v24, 0.0  ;;  %v474_v33 = vcombine.low %v411_v51, %v412_v25  ;;  %v430_v40 = vmul.f32 %v3339_v54, %v3450_v0  ;;  %v3477_v35 = vcombine.high %v3379_v37, %v4133_v39 }
  0x9e   :  { %519 = vadd.xlane.f32.xlu1 %v518_v23  ;;  %513 = vadd.xlane.f32.xlu0 %v512_v44  ;;  %v533_v38 = vsel %vm505_vm0, %v482_v45, 0.0  ;;  %v478_v47 = vcombine.low %v419_v27, %v420_v26  ;;  %v436_v48 = vmul.f32 %v3335_v53, %v3456_v46  ;;  %v3484_v52 = vcombine.high %v3419_v56, %v4133_v39 }
  0x9f   :  { %v429_v57 = vmul.f32 %v3328_v50, %v3462_v42  ;;  %v3490_v58 = vcombine.high %v3367_v31, %v4133_v39  ;;  %v435_v61 = vmul.f32 %v3323_v49, %v3470_v29  ;;  %v3496_v62 = vcombine.high %v3433_v18, %v4133_v39 }
  0xa0   :  { %v509_v53 = vsel %vm505_vm0, %v474_v33, 0.0  ;;  %v422_v5 = vmul.f32 %v404_v30, %v3477_v35  ;;  %v3502_v6 = vcombine.high %v3390_v55, %v4133_v39  ;;  %v521_v7 = vsel %vm505_vm0, %v478_v47, 0.0 }
  0xa1   :  { %v483_v4 = vcombine.low %v429_v57, %v430_v40  ;;  %v486_v9 = vcombine.low %v435_v61, %v436_v48  ;;  %v416_v49 = vmul.f32 %v3339_v54, %v3484_v52  ;;  %v3509_v10 = vcombine.high %v3401_v60, %v4133_v39 }
  0xa2   :  { %543 = vadd.xlane.f32.xlu1 %v542_v32  ;;  %534 = vadd.xlane.f32.xlu0 %v533_v38  ;;  %v421_v11 = vmul.f32 %v3049_v1, %v3490_v58  ;;  %v3514_v63 = vcombine.high %v3406_v2, %v4133_v39  ;;  %v415_v13 = vmul.f32 %v3328_v50, %v3496_v62 }
  0xa3   :  { %v3520_v15 = vcombine.high %v3409_v3, %v4133_v39  ;;  %v536_v17 = vsel %vm505_vm0, %v483_v4, 0.0  ;;  %v438_v20 = vmul.f32 %v404_v30, %v3502_v6  ;;  %v545_v23 = vsel %vm505_vm0, %v486_v9, 0.0 }
  0xa4   :  { %v479_v19 = vcombine.low %v421_v11, %v422_v5  ;;  %v476_v24 = vcombine.low %v415_v13, %v416_v49  ;;  %v432_v25 = vmul.f32 %v3339_v54, %v3509_v10  ;;  %v3529_v44 = vcombine.high %v3425_v16, %v4133_v39 }
  0xa5   :  { %v437_v45 = vmul.f32 %v3049_v1, %v3514_v63  ;;  %v431_v26 = vmul.f32 %v3328_v50, %v3520_v15  ;;  %v3536_v51 = vcombine.high %v3443_v21, %v4133_v39  ;;  %v3543_v38 = vcombine.high %v3456_v46, %v4133_v39 }
  0xa6   :  { %510 = vadd.xlane.f32.xlu1 %v509_v53  ;;  %522 = vadd.xlane.f32.xlu0 %v521_v7  ;;  %4161 = vst [vmem:[#allocation7_spill] sm:$0xff] %v3529_v44  ;;  %v524_v27 = vsel %vm505_vm0, %v479_v19, 0.0  ;;  %v515_v54 = vsel %vm505_vm0, %v476_v24, 0.0  ;;  %v424_v40 = vmul.f32 %v404_v30, %v3529_v44  ;;  %v3548_v47 = vcombine.high %v3470_v29, %v4133_v39 }
  0xa7   :  { %4162 = vst [vmem:[#allocation8_spill] sm:$0xff] %v3536_v51  ;;  %v487_v32 = vcombine.low %v437_v45, %v438_v20  ;;  %v484_v33 = vcombine.low %v431_v26, %v432_v25  ;;  %4163 = vst [vmem:[#allocation9_spill] sm:$0xff] %v3543_v38  ;;  %v423_v50 = vmul.f32 %v3049_v1, %v3536_v51 }
  0xa8   :  { %4164 = vst [vmem:[#allocation10_spill] sm:$0xff] %v3548_v47  ;;  %v440_v53 = vmul.f32 %v404_v30, %v3543_v38  ;;  %v439_v4 = vmul.f32 %v3049_v1, %v3548_v47 }
  0xa9   :  { %v548_v48 = vsel %vm505_vm0, %v487_v32, 0.0  ;;  %v539_v57 = vsel %vm505_vm0, %v484_v33, 0.0  ;;  %v480_v61 = vcombine.low %v423_v50, %v424_v40 }
  0xaa   :  { %537 = vadd.xlane.f32.xlu1 %v536_v17  ;;  %546 = vadd.xlane.f32.xlu0 %v545_v23  ;;  %v488_v7 = vcombine.low %v439_v4, %v440_v53  ;;  %v571_v23 = vand.u32 127, %v109_v8 }
  0xab   :  { %v527_v5 = vsel %vm505_vm0, %v480_v61, 0.0 }
  0xac   :  { %v551_v9 = vsel %vm505_vm0, %v488_v7, 0.0  ;;  %v576_v24 = vadd.s32 4294967288, %v571_v23  ;;  %v3583_v32 = vsub.s32 %v571_v23, %v3282_v12 }
  0xae   :  { %525 = vadd.xlane.f32.xlu1 %v524_v27  ;;  %516 = vadd.xlane.f32.xlu0 %v515_v54  ;;  %v3578_v26 = vsub.s32 %v576_v24, %v3282_v12 }
  0xb2   :  { %549 = vadd.xlane.f32.xlu1 %v548_v48  ;;  %540 = vadd.xlane.f32.xlu0 %v539_v57 }
  0xb6   :  { %528 = vadd.xlane.f32.xlu0 %v527_v5 }
  0xba   :  { %552 = vadd.xlane.f32.xlu0 %v551_v9 }
 0x127   :  { %v3556_v49 = vpop.xlane.xlu1 %531  ;;  %v3558_v11 = vpop.xlane.xlu0 %507 }
 0x128   :  { %v575_v48 = vrot.slane %v3558_v11, %v3583_v32 }
 0x12b   :  { %v3560_v13 = vpop.xlane.xlu1 %519  ;;  %v3562_v17 = vpop.xlane.xlu0 %513 }
 0x12c   :  { %v586_v33 = vrot.slane %v3562_v17, %v3583_v32  ;;  %v595_v9 = vrot.slane %v3560_v13, %v3583_v32 }
 0x12f   :  { %v3564_v19 = vpop.xlane.xlu1 %543  ;;  %v3566_v30 = vpop.xlane.xlu0 %534 }
 0x130   :  { %v617_v4 = vrot.slane %v3566_v30, %v3578_v26 }
 0x133   :  { %v3568_v1 = vpop.xlane.xlu1 %510  ;;  %v3570_v20 = vpop.xlane.xlu0 %522 }
 0x134   :  { %v580_v8 = vrot.slane %v3568_v1, %v3578_v26  ;;  %v599_v53 = vrot.slane %v3570_v20, %v3578_v26 }
 0x136   :  { %v582_v5 = vsel %vm581_vm1, %v580_v8, %v575_v48 }
 0x137   :  { %v3573_v25 = vpop.xlane.xlu0 %546  ;;  %v3575_v45 = vpop.xlane.xlu1 %537 }
 0x138   :  { %v622_v7 = vrot.slane %v3575_v45, %v3583_v32  ;;  %v635_v39 = vrot.slane %v3573_v25, %v3578_v26 }
 0x13b   :  { %v3580_v27 = vpop.xlane.xlu0 %516  ;;  %v3591_v40 = vpop.xlane.xlu1 %525 }
 0x13c   :  { %v590_v54 = vrot.slane %v3580_v27, %v3578_v26 }
 0x13e   :  { %v591_v57 = vsel %vm581_vm1, %v590_v54, %v586_v33  ;;  %v613_v54 = vrot.slane %v3556_v49, %v3583_v32  ;;  %v604_v33 = vrot.slane %v3591_v40, %v3583_v32 }
 0x13f   :  { %v3593_v50 = vpop.xlane.xlu0 %540  ;;  %v647_v24 = vsel %vm646_vm2, %v591_v57, %v582_v5  ;;  %v3621_v41 = vpop.xlane.xlu1 %549  ;;  %v600_v57 = vsel %vm581_vm1, %v599_v53, %v595_v9 }
 0x140   :  { %v626_v61 = vrot.slane %v3593_v50, %v3578_v26  ;;  %v618_v5 = vsel %vm581_vm1, %v617_v4, %v613_v54  ;;  %v649_v38 = vsel %vm648_vm3, %v600_v57, %v647_v24  ;;  %v640_v51 = vrot.slane %v3621_v41, %v3583_v32 }
 0x142   :  { %v627_v8 = vsel %vm581_vm1, %v626_v61, %v622_v7  ;;  %v631_v61 = vrot.slane %v3564_v19, %v3583_v32 }
 0x143   :  { %v3609_v23 = vpop.xlane.xlu0 %528  ;;  %v652_v44 = vsel %vm646_vm2, %v627_v8, %v618_v5  ;;  %v3644_v8 = vsub.s32 0, %v3282_v12 }
 0x144   :  { %v608_v48 = vrot.slane %v3609_v23, %v3578_v26  ;;  %v636_v9 = vsel %vm581_vm1, %v635_v39, %v631_v61 }
 0x145   :  { %v653_v54 = vsel %vm648_vm3, %v636_v9, %v652_v44  ;;  %4165 = vst [vmem:[#allocation11_spill] sm:$0xff] %v3644_v8 }
 0x146   :  { %v609_v28 = vsel %vm581_vm1, %v608_v48, %v604_v33 }
 0x147   :  { %v3629_v7 = vpop.xlane.xlu0 %552  ;;  %v651_v47 = vsel %vm650_vm4, %v609_v28, %v649_v38  ;;  %v3226_v38 = vmov 0  }
 0x148   :  { %v644_v53 = vrot.slane %v3629_v7, %v3578_v26  ;;  %v658_v4 = vsel %vm657_vm5, %v651_v47, -inf  ;;  %3111 = vset.pattern.permute.xlu0 %v3226_v38  ;;  %3110 = vset.pattern.permute.xlu1 %v3226_v38  ;;  %v3647_v47 = vsub.s32 1, %v3282_v12 }
 0x149   :  { %659 = vmax.xlane.f32.xlu1 %v658_v4 }
 0x14a   :  { %v645_v24 = vsel %vm581_vm1, %v644_v53, %v640_v51  ;;  %v3655_v53 = vsub.s32 2, %v3282_v12 }
 0x14b   :  { %v654_v33 = vsel %vm650_vm4, %v645_v24, %v653_v54  ;;  %v3658_v24 = vsub.s32 3, %v3282_v12 }
 0x14c   :  { %v661_v28 = vsel %vm657_vm5, %v654_v33, -inf }
 0x14d   :  { %662 = vmax.xlane.f32.xlu0 %v661_v28 }
 0x1d6   :  { %v660_v48 = vpop.xlane.xlu1 %659 }
 0x1d7   :  { %v669_v39 = vrot.slane %v660_v48, %v3644_v8  ;;  %v673_v51 = vrot.slane %v660_v48, %v3647_v47 }
 0x1d9   :  { %v706_v44 = vsub.f32 %v3558_v11, %v669_v39  ;;  %v707_v57 = vsub.f32 %v3568_v1, %v669_v39  ;;  %v708_v5 = vsub.f32 %v3562_v17, %v673_v51  ;;  %v709_v33 = vsub.f32 %v3580_v27, %v673_v51 }
 0x1da   :  { %v663_v61 = vpop.xlane.xlu0 %662  ;;  %v681_v17 = vrot.slane %v660_v48, %v3658_v24 }
 0x1db   :  { %v722_v4 = vmul.f32 1.442695, %v706_v44  ;;  %v724_v9 = vmul.f32 1.442695, %v707_v57  ;;  %v685_v54 = vrot.slane %v663_v61, %v3644_v8  ;;  %v726_v28 = vmul.f32 1.442695, %v708_v5 }
 0x1dc   :  { %v693_v11 = vrot.slane %v663_v61, %v3655_v53  ;;  %v728_v38 = vmul.f32 1.442695, %v709_v33  ;;  %v712_v44 = vsub.f32 %v3591_v40, %v681_v17  ;;  %v689_v57 = vrot.slane %v663_v61, %v3647_v47 }
 0x1dd   :  { %3112 = vpow2.f32 %v722_v4  ;;  %v714_v1 = vsub.f32 %v3556_v49, %v685_v54  ;;  %v697_v27 = vrot.slane %v663_v61, %v3658_v24  ;;  %v715_v51 = vsub.f32 %v3566_v30, %v685_v54 }
 0x1de   :  { %3114 = vpow2.f32 %v724_v9  ;;  %v718_v39 = vsub.f32 %v3564_v19, %v693_v11  ;;  %v734_v49 = vmul.f32 1.442695, %v712_v44  ;;  %v716_v33 = vsub.f32 %v3575_v45, %v689_v57 }
 0x1df   :  { %3116 = vpow2.f32 %v726_v28  ;;  %v738_v8 = vmul.f32 1.442695, %v714_v1  ;;  %v720_v19 = vsub.f32 %v3621_v41, %v697_v27  ;;  %v740_v40 = vmul.f32 1.442695, %v715_v51 }
 0x1e0   :  { %3118 = vpow2.f32 %v728_v38  ;;  %v746_v5 = vmul.f32 1.442695, %v718_v39  ;;  %v742_v30 = vmul.f32 1.442695, %v716_v33  ;;  %v677_v54 = vrot.slane %v660_v48, %v3655_v53 }
 0x1e1   :  { %3120 = vpow2.f32 %v738_v8  ;;  %v717_v28 = vsub.f32 %v3593_v50, %v689_v57  ;;  %v750_v45 = vmul.f32 1.442695, %v720_v19  ;;  %v719_v51 = vsub.f32 %v3573_v25, %v693_v11  ;;  %v19_v19 = vld [vmem:[%s4131_s2] sm:$0xff] }
 0x1e2   :  { %3122 = vpow2.f32 %v746_v5  ;;  %v710_v41 = vsub.f32 %v3560_v13, %v677_v54  ;;  %v711_v50 = vsub.f32 %v3570_v20, %v677_v54  ;;  %v713_v20 = vsub.f32 %v3609_v23, %v681_v17  ;;  %v23_v54 = vld [vmem:[%s4131_s2 + $0x20] sm:$0xff] }
 0x1e3   :  { %3124 = vpow2.f32 %v734_v49  ;;  %v744_v1 = vmul.f32 1.442695, %v717_v28  ;;  %v748_v33 = vmul.f32 1.442695, %v719_v51  ;;  %v721_v11 = vsub.f32 %v3629_v7, %v697_v27  ;;  %v25_v7 = vld [vmem:[%s4131_s2 + $0x30] sm:$0xff] }
 0x1e4   :  { %3126 = vpow2.f32 %v740_v40  ;;  %v730_v48 = vmul.f32 1.442695, %v710_v41  ;;  %v732_v13 = vmul.f32 1.442695, %v711_v50  ;;  %v736_v25 = vmul.f32 1.442695, %v713_v20 }
 0x1e5   :  { %3128 = vpow2.f32 %v742_v30  ;;  %v21_v30 = vld [vmem:[%s4131_s2 + $0x10] sm:$0xff]  ;;  %v752_v17 = vmul.f32 1.442695, %v721_v11  ;;  %v22_v50 = vld [vmem:[%s4131_s2 + $0x18] sm:$0xff] }
 0x1e6   :  { %3130 = vpow2.f32 %v750_v45 }
 0x1e7   :  { %v3670_v4 = vpop.eup %3112  ;;  %3132 = vpow2.f32 %v744_v1  ;;  %v20_v1 = vld [vmem:[%s4131_s2 + $0x8] sm:$0xff] }
 0x1e8   :  { %v3672_v9 = vpop.eup %3114  ;;  %771 = vperm.xlu1 %3110, %v3670_v4   ;;  %3134 = vpow2.f32 %v730_v48  ;;  %v24_v48 = vld [vmem:[%s4131_s2 + $0x28] sm:$0xff] }
 0x1e9   :  { %774 = vperm.xlu0 %3111, %v3672_v9   ;;  %v3678_v61 = vpop.eup %3116  ;;  %3136 = vpow2.f32 %v732_v13  ;;  %v26_v13 = vld [vmem:[%s4131_s2 + $0x38] sm:$0xff] }
 0x1ea   :  { %4166 = vst [vmem:[#allocation12_spill] sm:$0xff] %v3678_v61  ;;  %v3683_v8 = vpop.eup %3118  ;;  %3138 = vpow2.f32 %v748_v33 }
 0x1eb   :  { %4167 = vst [vmem:[#allocation13_spill] sm:$0xff] %v3683_v8  ;;  %v3687_v38 = vpop.eup %3120  ;;  %3140 = vpow2.f32 %v736_v25 }
 0x1ec   :  { %777 = vperm.xlu1 %3110, %v3678_v61   ;;  %4168 = vst [vmem:[#allocation14_spill] sm:$0xff] %v3687_v38  ;;  %v3689_v39 = vpop.eup %3122  ;;  %3142 = vpow2.f32 %v752_v17 }
 0x1ed   :  { %4169 = vst [vmem:[#allocation15_spill] sm:$0xff] %v3689_v39  ;;  %807 = vperm.xlu0 %3111, %v3689_v39   ;;  %v3694_v44 = vpop.eup %3124 }
 0x1ee   :  { %4170 = vst [vmem:[#allocation16_spill] sm:$0xff] %v3694_v44  ;;  %v3696_v57 = vpop.eup %3126 }
 0x1ef   :  { %4171 = vst [vmem:[#allocation17_spill] sm:$0xff] %v3696_v57  ;;  %v3701_v5 = vpop.eup %3128 }
 0x1f0   :  { %780 = vperm.xlu1 %3110, %v3683_v8   ;;  %4172 = vst [vmem:[#allocation18_spill] sm:$0xff] %v3701_v5  ;;  %v3703_v49 = vpop.eup %3130 }
 0x1f1   :  { %789 = vperm.xlu0 %3111, %v3694_v44   ;;  %4173 = vst [vmem:[#allocation19_spill] sm:$0xff] %v3703_v49  ;;  %v3711_v40 = vpop.eup %3132 }
 0x1f2   :  { %4174 = vst [vmem:[#allocation20_spill] sm:$0xff] %v3711_v40  ;;  %v3718_v23 = vpop.eup %3134 }
 0x1f3   :  { %4175 = vst [vmem:[#allocation21_spill] sm:$0xff] %v3718_v23  ;;  %v3724_v28 = vpop.eup %3136 }
 0x1f4   :  { %795 = vperm.xlu1 %3110, %v3687_v38   ;;  %4176 = vst [vmem:[#allocation22_spill] sm:$0xff] %v3724_v28  ;;  %v3730_v27 = vpop.eup %3138 }
 0x1f5   :  { %813 = vperm.xlu0 %3111, %v3703_v49   ;;  %4177 = vst [vmem:[#allocation23_spill] sm:$0xff] %v3730_v27  ;;  %v3733_v45 = vpop.eup %3140 }
 0x1f6   :  { %4178 = vst [vmem:[#allocation24_spill] sm:$0xff] %v3733_v45  ;;  %v3736_v41 = vpop.eup %3142 }
 0x1f7   :  { %4179 = vst [vmem:[#allocation25_spill] sm:$0xff] %v3736_v41 }
 0x1f8   :  { %798 = vperm.xlu1 %3110, %v3696_v57  }
 0x1f9   :  { %972 = vperm.xlu0 %3111, %v19_v19  }
 0x1fc   :  { %801 = vperm.xlu1 %3110, %v3701_v5  }
 0x1fd   :  { %980 = vperm.xlu0 %3111, %v21_v30  }
 0x200   :  { %804 = vperm.xlu1 %3110, %v3711_v40  }
 0x201   :  { %988 = vperm.xlu0 %3111, %v23_v54  }
 0x204   :  { %783 = vperm.xlu1 %3110, %v3718_v23  }
 0x205   :  { %996 = vperm.xlu0 %3111, %v25_v7  }
 0x208   :  { %786 = vperm.xlu1 %3110, %v3724_v28  }
 0x20c   :  { %810 = vperm.xlu1 %3110, %v3730_v27  }
 0x210   :  { %792 = vperm.xlu1 %3110, %v3733_v45  }
 0x214   :  { %816 = vperm.xlu1 %3110, %v3736_v41  }
 0x218   :  { %976 = vperm.xlu1 %3110, %v20_v1   ;;  %v3227_v1 = vmov 839922192  }
 0x21c   :  { %984 = vperm.xlu1 %3110, %v22_v50   ;;  %v1003_v50 = vunpack.c.l.s4 %v3227_v1 }
 0x21e   :  { %v1004_v49 = vunpack.c.0.s8 %v1003_v50 }
 0x220   :  { %992 = vperm.xlu1 %3110, %v24_v48   ;;  %v3228_v48 = vmov 1985246804   ;;  %v3755_v40 = vsub.s32 %v1004_v49, %v3282_v12 }
 0x221   :  { %v1010_v45 = vunpack.c.l.s4 %v3228_v48 }
 0x224   :  { %1000 = vperm.xlu1 %3110, %v26_v13   ;;  %v1011_v13 = vunpack.c.0.s8 %v1010_v45 }
 0x226   :  { %v3761_v1 = vsub.s32 %v1011_v13, %v3282_v12 }
 0x267   :  { %v772_v51 = vpop.permute.xlu1 %771 }
 0x268   :  { %v775_v33 = vpop.permute.xlu0 %774  ;;  %v821_v57 = vrot.slane %v772_v51, %v3583_v32 }
 0x269   :  { %v825_v23 = vrot.slane %v775_v33, %v3578_v26 }
 0x26b   :  { %v778_v20 = vpop.permute.xlu1 %777 }
 0x26c   :  { %v808_v25 = vpop.permute.xlu0 %807  ;;  %v830_v8 = vrot.slane %v778_v20, %v3583_v32 }
 0x26d   :  { %v875_v51 = vrot.slane %v808_v25, %v3583_v32 }
 0x26f   :  { %v781_v19 = vpop.permute.xlu1 %780 }
 0x270   :  { %v790_v30 = vpop.permute.xlu0 %789  ;;  %v834_v44 = vrot.slane %v781_v19, %v3578_v26  ;;  %v826_v19 = vsel %vm581_vm1, %v825_v23, %v821_v57 }
 0x271   :  { %v848_v13 = vrot.slane %v790_v30, %v3583_v32 }
 0x272   :  { %v835_v50 = vsel %vm581_vm1, %v834_v44, %v830_v8 }
 0x273   :  { %v796_v11 = vpop.permute.xlu1 %795  ;;  %v890_v12 = vsel %vm646_vm2, %v835_v50, %v826_v19 }
 0x274   :  { %v3751_v7 = vpop.permute.xlu0 %813  ;;  %v857_v8 = vrot.slane %v796_v11, %v3583_v32 }
 0x277   :  { %v799_v17 = vpop.permute.xlu1 %798 }
 0x278   :  { %v973_v27 = vpop.permute.xlu0 %972  ;;  %v861_v23 = vrot.slane %v799_v17, %v3578_v26 }
 0x279   :  { %v1008_v49 = vrot.slane %v973_v27, %v3755_v40  ;;  %v1015_v61 = vrot.slane %v973_v27, %v3761_v1 }
 0x27b   :  { %v802_v54 = vpop.permute.xlu1 %801  ;;  %v1130_v50 = vmul.f32 %v1008_v49, %v3361_v22  ;;  %v1131_v30 = vmul.f32 %v1015_v61, %v3376_v36  ;;  %v1146_v11 = vmul.f32 %v1008_v49, %v3354_v14 }
 0x27c   :  { %v981_v48 = vpop.permute.xlu0 %980  ;;  %v866_v27 = vrot.slane %v802_v54, %v3583_v32 }
 0x27d   :  { %v1043_v44 = vrot.slane %v981_v48, %v3761_v1 }
 0x27f   :  { %v805_v41 = vpop.permute.xlu1 %804  ;;  %v1151_v49 = vmul.f32 %v1043_v44, %v3450_v0 }
 0x280   :  { %v870_v33 = vrot.slane %v805_v41, %v3578_v26  ;;  %v989_v57 = vpop.permute.xlu0 %988 }
 0x281   :  { %v1064_v17 = vrot.slane %v989_v57, %v3755_v40  ;;  %v1071_v54 = vrot.slane %v989_v57, %v3761_v1 }
 0x282   :  { %v871_v38 = vsel %vm581_vm1, %v870_v33, %v866_v27 }
 0x283   :  { %v784_v28 = vpop.permute.xlu1 %783 }
 0x284   :  { %v839_v20 = vrot.slane %v784_v28, %v3583_v32 }
 0x287   :  { %v787_v39 = vpop.permute.xlu1 %786 }
 0x288   :  { %v843_v45 = vrot.slane %v787_v39, %v3578_v26  ;;  %v1036_v39 = vrot.slane %v981_v48, %v3755_v40  ;;  %v1147_v48 = vmul.f32 %v1015_v61, %v3371_v34 }
 0x28a   :  { %v844_v25 = vsel %vm581_vm1, %v843_v45, %v839_v20  ;;  %v1134_v45 = vmul.f32 %v1036_v39, %v3385_v43  ;;  %v1150_v14 = vmul.f32 %v1036_v39, %v3462_v42  ;;  %v884_v20 = vrot.slane %v3751_v7, %v3583_v32  ;;  %v997_v39 = vpop.permute.xlu0 %996 }
 0x28b   :  { %v811_v5 = vpop.permute.xlu1 %810  ;;  %v891_v36 = vsel %vm648_vm3, %v844_v25, %v890_v12  ;;  %v862_v43 = vsel %vm581_vm1, %v861_v23, %v857_v8  ;;  %v1138_v12 = vmul.f32 %v1064_v17, %v3367_v31  ;;  %v1139_v42 = vmul.f32 %v1071_v54, %v3379_v37 }
 0x28c   :  { %v879_v41 = vrot.slane %v811_v5, %v3578_v26  ;;  %v1135_v5 = vmul.f32 %v1043_v44, %v3398_v59  ;;  %v893_v0 = vsel %vm646_vm2, %v871_v38, %v862_v43  ;;  %v1202_v7 = vcombine.low %v1146_v11, %v1147_v48 }
 0x28d   :  { %v1204_v8 = vcombine.low %v1150_v14, %v1151_v49  ;;  %v1099_v11 = vrot.slane %v997_v39, %v3761_v1 }
 0x28e   :  { %v880_v34 = vsel %vm581_vm1, %v879_v41, %v875_v51  ;;  %v1194_v51 = vcombine.low %v1130_v50, %v1131_v30  ;;  %v1196_v27 = vcombine.low %v1134_v45, %v1135_v5  ;;  %v1154_v41 = vmul.f32 %v1064_v17, %v3406_v2 }
 0x28f   :  { %v793_v28 = vpop.permute.xlu1 %792  ;;  %v894_v57 = vsel %vm648_vm3, %v880_v34, %v893_v0  ;;  %v1198_v50 = vcombine.low %v1138_v12, %v1139_v42  ;;  %v1092_v30 = vrot.slane %v997_v39, %v3755_v40  ;;  %v1262_v5 = vsel %vm505_vm0, %v1202_v7, 0.0 }
 0x290   :  { %v852_v19 = vrot.slane %v793_v28, %v3578_v26  ;;  %v1155_v28 = vmul.f32 %v1071_v54, %v3390_v55  ;;  %v1226_v45 = vsel %vm505_vm0, %v1194_v51, 0.0  ;;  %v1235_v55 = vsel %vm505_vm0, %v1196_v27, 0.0 }
 0x291   :  { %v1271_v54 = vsel %vm505_vm0, %v1204_v8, 0.0  ;;  %v1143_v34 = vmul.f32 %v1099_v11, %v3477_v35  ;;  %v1158_v51 = vmul.f32 %v1092_v30, %v3514_v63 }
 0x292   :  { %v853_v22 = vsel %vm581_vm1, %v852_v19, %v848_v13 }
 0x293   :  { %v817_v61 = vpop.permute.xlu1 %816  ;;  %v892_v33 = vsel %vm650_vm4, %v853_v22, %v891_v36 }
 0x294   :  { %v888_v59 = vrot.slane %v817_v61, %v3578_v26  ;;  %v898_v13 = vsel %vm657_vm5, %v892_v33, 0.0 }
 0x295   :  { %899 = vadd.xlane.f32.xlu0 %v898_v13 }
 0x296   :  { %v889_v44 = vsel %vm581_vm1, %v888_v59, %v884_v20 }
 0x297   :  { %v977_v23 = vpop.permute.xlu1 %976  ;;  %v895_v25 = vsel %vm650_vm4, %v889_v44, %v894_v57 }
 0x298   :  { %v1022_v31 = vrot.slane %v977_v23, %v3755_v40  ;;  %v1029_v37 = vrot.slane %v977_v23, %v3761_v1  ;;  %v901_v38 = vsel %vm657_vm5, %v895_v25, 0.0 }
 0x299   :  { %902 = vadd.xlane.f32.xlu1 %v901_v38 }
 0x29a   :  { %v1132_v19 = vmul.f32 %v1022_v31, %v3433_v18  ;;  %v1133_v48 = vmul.f32 %v1029_v37, %v3419_v56  ;;  %v1148_v2 = vmul.f32 %v1022_v31, %v3409_v3  ;;  %v1149_v17 = vmul.f32 %v1029_v37, %v3401_v60 }
 0x29b   :  { %v985_v22 = vpop.permute.xlu1 %984  ;;  %v1206_v56 = vcombine.low %v1154_v41, %v1155_v28  ;;  %v1244_v3 = vsel %vm505_vm0, %v1198_v50, 0.0  ;;  %v1142_v60 = vmul.f32 %v1092_v30, %v3490_v58 }
 0x29c   :  { %v1195_v36 = vcombine.low %v1132_v19, %v1133_v48  ;;  %v1203_v14 = vcombine.low %v1148_v2, %v1149_v17  ;;  %v1050_v49 = vrot.slane %v985_v22, %v3755_v40  ;;  %v1057_v18 = vrot.slane %v985_v22, %v3761_v1  ;;  %v4180_v19 = vld [vmem:[#allocation8_spill] sm:$0xff] }
 0x29d   :  { %v1280_v44 = vsel %vm505_vm0, %v1206_v56, 0.0  ;;  %v1200_v63 = vcombine.low %v1142_v60, %v1143_v34 }
 0x29e   :  { %v1227_v61 = vsel %vm505_vm0, %v1195_v36, 0.0  ;;  %v1263_v33 = vsel %vm505_vm0, %v1203_v14, 0.0  ;;  %v1136_v20 = vmul.f32 %v1050_v49, %v3496_v62  ;;  %v1137_v43 = vmul.f32 %v1057_v18, %v3484_v52  ;;  %v4183_v36 = vld [vmem:[#allocation9_spill] sm:$0xff] }
 0x29f   :  { %v1228_v59 = vadd.f32 %v1227_v61, %v1226_v45  ;;  %v1264_v13 = vadd.f32 %v1263_v33, %v1262_v5  ;;  %v1152_v12 = vmul.f32 %v1050_v49, %v3520_v15  ;;  %v1153_v42 = vmul.f32 %v1057_v18, %v3509_v10  ;;  %v993_v0 = vpop.permute.xlu1 %992  ;;  %v4181_v45 = vld [vmem:[#allocation7_spill] sm:$0xff] }
 0x2a0   :  { %v1197_v58 = vcombine.low %v1136_v20, %v1137_v43  ;;  %v1078_v35 = vrot.slane %v993_v0, %v3755_v40  ;;  %v1085_v39 = vrot.slane %v993_v0, %v3761_v1  ;;  %v1159_v62 = vmul.f32 %v1099_v11, %v3502_v6 }
 0x2a1   :  { %v1229_v57 = vrot.slane %v1228_v59, 4  ;;  %v1205_v52 = vcombine.low %v1152_v12, %v1153_v42  ;;  %v1265_v8 = vrot.slane %v1264_v13, 4  ;;  %v1253_v60 = vsel %vm505_vm0, %v1200_v63, 0.0 }
 0x2a2   :  { %v1236_v7 = vsel %vm505_vm0, %v1197_v58, 0.0  ;;  %v1140_v15 = vmul.f32 %v1078_v35, %v3443_v21  ;;  %v1141_v10 = vmul.f32 %v1085_v39, %v3425_v16  ;;  %v1156_v27 = vmul.f32 %v1078_v35, %v3470_v29 }
 0x2a3   :  { %v1237_v23 = vadd.f32 %v1236_v7, %v1235_v55  ;;  %v1272_v25 = vsel %vm505_vm0, %v1205_v52, 0.0  ;;  %v1001_v41 = vpop.permute.xlu1 %1000  ;;  %v1157_v37 = vmul.f32 %v1085_v39, %v3456_v46  ;;  %v1208_v28 = vcombine.low %v1158_v51, %v1159_v62  ;;  %v4182_v55 = vld [vmem:[#allocation10_spill] sm:$0xff] }
 0x2a4   :  { %v1273_v31 = vadd.f32 %v1272_v25, %v1271_v54  ;;  %v1199_v6 = vcombine.low %v1140_v15, %v1141_v10  ;;  %v1106_v38 = vrot.slane %v1001_v41, %v3755_v40  ;;  %v1230_v50 = vadd.f32 %v1229_v57, %v1228_v59 }
 0x2a5   :  { %v1238_v30 = vrot.slane %v1237_v23, 4  ;;  %v1113_v21 = vrot.slane %v1001_v41, %v3761_v1  ;;  %v1207_v11 = vcombine.low %v1156_v27, %v1157_v37  ;;  %v1266_v54 = vadd.f32 %v1265_v8, %v1264_v13 }
 0x2a6   :  { %v1274_v16 = vrot.slane %v1273_v31, 4  ;;  %v1245_v29 = vsel %vm505_vm0, %v1199_v6, 0.0  ;;  %v1144_v48 = vmul.f32 %v1106_v38, %v4180_v19  ;;  %v1160_v46 = vmul.f32 %v1106_v38, %v4182_v55 }
 0x2a7   :  { %v1239_v2 = vadd.f32 %v1238_v30, %v1237_v23  ;;  %v1246_v17 = vadd.f32 %v1245_v29, %v1244_v3  ;;  %v1145_v5 = vmul.f32 %v1113_v21, %v4181_v45  ;;  %v1281_v40 = vsel %vm505_vm0, %v1207_v11, 0.0 }
 0x2a8   :  { %v1275_v22 = vadd.f32 %v1274_v16, %v1273_v31  ;;  %v1161_v14 = vmul.f32 %v1113_v21, %v4183_v36  ;;  %v1282_v18 = vadd.f32 %v1281_v40, %v1280_v44  ;;  %v1231_v34 = vrot.slane %v1230_v50, 2 }
 0x2a9   :  { %v1240_v49 = vrot.slane %v1239_v2, 2  ;;  %v1247_v1 = vrot.slane %v1246_v17, 4  ;;  %v1201_v56 = vcombine.low %v1144_v48, %v1145_v5  ;;  %v1289_v3 = vsel %vm505_vm0, %v1208_v28, 0.0 }
 0x2aa   :  { %v1276_v61 = vrot.slane %v1275_v22, 2  ;;  %v1209_v33 = vcombine.low %v1160_v46, %v1161_v14  ;;  %v1283_v43 = vrot.slane %v1282_v18, 4  ;;  %v1267_v13 = vrot.slane %v1266_v54, 2 }
 0x2ab   :  { %v1248_v20 = vadd.f32 %v1247_v1, %v1246_v17  ;;  %v1254_v59 = vsel %vm505_vm0, %v1201_v56, 0.0  ;;  %v1241_v0 = vadd.f32 %v1240_v49, %v1239_v2  ;;  %v1232_v44 = vadd.f32 %v1231_v34, %v1230_v50  ;;  %v4184_v1 = vld [vmem:[#allocation11_spill] sm:$0xff] }
 0x2ac   :  { %v1255_v12 = vadd.f32 %v1254_v59, %v1253_v60  ;;  %v1290_v42 = vsel %vm505_vm0, %v1209_v33, 0.0  ;;  %v1284_v51 = vadd.f32 %v1283_v43, %v1282_v18  ;;  %v1277_v62 = vadd.f32 %v1276_v61, %v1275_v22 }
 0x2ad   :  { %v1291_v58 = vadd.f32 %v1290_v42, %v1289_v3  ;;  %v1249_v35 = vrot.slane %v1248_v20, 2  ;;  %v1242_v15 = vrot.slane %v1241_v0, 1  ;;  %v1268_v27 = vadd.f32 %v1267_v13, %v1266_v54 }
 0x2ae   :  { %v1256_v39 = vrot.slane %v1255_v12, 4  ;;  %v1285_v7 = vrot.slane %v1284_v51, 2  ;;  %v1233_v25 = vrot.slane %v1232_v44, 1  ;;  %v1278_v31 = vrot.slane %v1277_v62, 1 }
 0x2af   :  { %v1292_v57 = vrot.slane %v1291_v58, 4  ;;  %v1250_v52 = vadd.f32 %v1249_v35, %v1248_v20  ;;  %v3856_v38 = vadd.f32 %v1242_v15, %v1241_v0  ;;  %v1269_v30 = vrot.slane %v1268_v27, 1 }
 0x2b0   :  { %v1257_v10 = vadd.f32 %v1256_v39, %v1255_v12  ;;  %v1286_v8 = vadd.f32 %v1285_v7, %v1284_v51  ;;  %v3860_v16 = vadd.f32 %v1233_v25, %v1232_v44  ;;  %v3862_v29 = vadd.f32 %v1278_v31, %v1277_v62  ;;  %v4186_v51 = vld [vmem:[#allocation12_spill] sm:$0xff]  ;;  %v4190_v7 = vld [vmem:[#allocation17_spill] sm:$0xff]  ;;  %v4194_v31 = vld [vmem:[#allocation22_spill] sm:$0xff] }
 0x2b1   :  { %v1251_v63 = vrot.slane %v1250_v52, 1  ;;  %v1293_v23 = vadd.f32 %v1292_v57, %v1291_v58  ;;  %v3871_v45 = vadd.f32 %v1269_v30, %v1268_v27  ;;  %v4189_v57 = vld [vmem:[#allocation21_spill] sm:$0xff]  ;;  %v4191_v27 = vld [vmem:[#allocation15_spill] sm:$0xff]  ;;  %v4193_v25 = vld [vmem:[#allocation16_spill] sm:$0xff] }
 0x2b2   :  { %v1258_v41 = vrot.slane %v1257_v10, 2  ;;  %v1287_v37 = vrot.slane %v1286_v8, 1  ;;  %v1306_v17 = vsel %vm646_vm2, %v3856_v38, %v3860_v16 }
 0x2b3   :  { %v1294_v6 = vrot.slane %v1293_v23, 2  ;;  %v3858_v50 = vadd.f32 %v1251_v63, %v1250_v52  ;;  %v1309_v54 = vsel %vm646_vm2, %v3862_v29, %v3871_v45 }
 0x2b4   :  { %v1259_v28 = vadd.f32 %v1258_v41, %v1257_v10  ;;  %v3864_v19 = vadd.f32 %v1287_v37, %v1286_v8  ;;  %v4192_v8 = vld [vmem:[#allocation20_spill] sm:$0xff] }
 0x2b5   :  { %v1295_v21 = vadd.f32 %v1294_v6, %v1293_v23  ;;  %v1307_v5 = vsel %vm648_vm3, %v3858_v50, %v1306_v17 }
 0x2b6   :  { %v1260_v11 = vrot.slane %v1259_v28, 1  ;;  %v1310_v40 = vsel %vm648_vm3, %v3864_v19, %v1309_v54 }
 0x2b7   :  { %v1296_v48 = vrot.slane %v1295_v21, 1 }
 0x2b8   :  { %v3866_v2 = vadd.f32 %v1260_v11, %v1259_v28  ;;  %v4195_v28 = vld [vmem:[#allocation19_spill] sm:$0xff] }
 0x2b9   :  { %v3875_v55 = vadd.f32 %v1296_v48, %v1295_v21  ;;  %v4196_v21 = vld [vmem:[#allocation23_spill] sm:$0xff] }
 0x2ba   :  { %v1308_v46 = vsel %vm650_vm4, %v3866_v2, %v1307_v5 }
 0x2bb   :  { %v1314_v22 = vsel %vm657_vm5, %v1308_v46, -inf  ;;  %v1311_v36 = vsel %vm650_vm4, %v3875_v55, %v1310_v40 }
 0x2bc   :  { %1315 = vmax.xlane.f32.xlu0 %v1314_v22  ;;  %v1317_v14 = vsel %vm657_vm5, %v1311_v36, -inf  ;;  %v4197_v36 = vld [vmem:[#allocation24_spill] sm:$0xff] }
 0x2c0   :  { %1318 = vmax.xlane.f32.xlu0 %v1317_v14 }
 0x322   :  { %v900_v49 = vpop.xlane.xlu0 %899 }
 0x323   :  { %v909_v18 = vrot.slane %v900_v49, %v4184_v1  ;;  %v913_v56 = vrot.slane %v900_v49, %v3647_v47  ;;  %v917_v33 = vrot.slane %v900_v49, %v3655_v53  ;;  %v921_v42 = vrot.slane %v900_v49, %v3658_v24 }
 0x325   :  { %3144 = vrcp.f32 %v909_v18 }
 0x326   :  { %v903_v60 = vpop.xlane.xlu1 %902  ;;  %3146 = vrcp.f32 %v913_v56 }
 0x327   :  { %v925_v34 = vrot.slane %v903_v60, %v4184_v1  ;;  %v929_v61 = vrot.slane %v903_v60, %v3647_v47  ;;  %v933_v20 = vrot.slane %v903_v60, %v3655_v53  ;;  %v4185_v47 = vld [vmem:[#allocation14_spill] sm:$0xff]  ;;  %v937_v53 = vrot.slane %v903_v60, %v3658_v24 }
 0x329   :  { %3148 = vrcp.f32 %v925_v34 }
 0x32a   :  { %3150 = vrcp.f32 %v929_v61  ;;  %v4198_v61 = vld [vmem:[#allocation25_spill] sm:$0xff] }
 0x32b   :  { %3152 = vrcp.f32 %v917_v33 }
 0x32c   :  { %3154 = vrcp.f32 %v933_v20 }
 0x32d   :  { %3156 = vrcp.f32 %v921_v42 }
 0x32e   :  { %3158 = vrcp.f32 %v937_v53 }
 0x32f   :  { %v3145_v3 = vpop.eup %3144 }
 0x330   :  { %v948_v43 = vmul.f32 %v3145_v3, %v3672_v9  ;;  %v947_v59 = vmul.f32 %v3145_v3, %v3670_v4  ;;  %v3147_v13 = vpop.eup %3146  ;;  %v4187_v9 = vld [vmem:[#allocation18_spill] sm:$0xff]  ;;  %v4188_v4 = vld [vmem:[#allocation13_spill] sm:$0xff] }
 0x331   :  { %v950_v58 = vmul.f32 %v3147_v13, %v4186_v51  ;;  %v951_v44 = vmul.f32 %v3147_v13, %v4188_v4 }
 0x332   :  { %1440 = vperm.xlu0 %3111, %v948_v43   ;;  %1437 = vperm.xlu1 %3110, %v947_v59  }
 0x333   :  { %v3149_v12 = vpop.eup %3148 }
 0x334   :  { %v959_v0 = vmul.f32 %v3149_v12, %v4185_v47  ;;  %v3151_v35 = vpop.eup %3150  ;;  %v960_v15 = vmul.f32 %v3149_v12, %v4190_v7 }
 0x335   :  { %v962_v39 = vmul.f32 %v3151_v35, %v4187_v9  ;;  %v3153_v62 = vpop.eup %3152  ;;  %v963_v23 = vmul.f32 %v3151_v35, %v4192_v8 }
 0x336   :  { %1461 = vperm.xlu0 %3111, %v959_v0   ;;  %1443 = vperm.xlu1 %3110, %v950_v58   ;;  %v953_v52 = vmul.f32 %v3153_v62, %v4189_v57  ;;  %v3155_v10 = vpop.eup %3154  ;;  %v954_v37 = vmul.f32 %v3153_v62, %v4194_v31 }
 0x337   :  { %v965_v63 = vmul.f32 %v3155_v10, %v4191_v27  ;;  %v3157_v24 = vpop.eup %3156  ;;  %v966_v11 = vmul.f32 %v3155_v10, %v4196_v21 }
 0x338   :  { %v956_v41 = vmul.f32 %v3157_v24, %v4193_v25  ;;  %v3159_v6 = vpop.eup %3158  ;;  %v957_v14 = vmul.f32 %v3157_v24, %v4197_v36 }
 0x339   :  { %v968_v30 = vmul.f32 %v3159_v6, %v4195_v28  ;;  %v969_v33 = vmul.f32 %v3159_v6, %v4198_v61 }
 0x33a   :  { %1467 = vperm.xlu0 %3111, %v962_v39   ;;  %1446 = vperm.xlu1 %3110, %v951_v44  }
 0x33e   :  { %1449 = vperm.xlu0 %3111, %v953_v52   ;;  %1464 = vperm.xlu1 %3110, %v960_v15  }
 0x342   :  { %1473 = vperm.xlu0 %3111, %v965_v63   ;;  %1470 = vperm.xlu1 %3110, %v963_v23  }
 0x346   :  { %1455 = vperm.xlu0 %3111, %v956_v41   ;;  %1452 = vperm.xlu1 %3110, %v954_v37  }
 0x349   :  { %v1316_v48 = vpop.xlane.xlu0 %1315 }
 0x34a   :  { %v1322_v17 = vrot.slane %v1316_v48, 1  ;;  %v1323_v5 = vrot.slane %v1316_v48, 2  ;;  %v1324_v46 = vrot.slane %v1316_v48, 3  ;;  %1479 = vperm.xlu0 %3111, %v968_v30   ;;  %1476 = vperm.xlu1 %3110, %v966_v11   ;;  %v1336_v54 = vsub.f32 %v3860_v16, %v1316_v48 }
 0x34c   :  { %v1337_v22 = vsub.f32 %v3856_v38, %v1322_v17  ;;  %v1338_v40 = vsub.f32 %v3858_v50, %v1323_v5  ;;  %v1339_v1 = vsub.f32 %v3866_v2, %v1324_v46  ;;  %v1344_v34 = vmul.f32 1.442695, %v1336_v54 }
 0x34d   :  { %v1319_v49 = vpop.xlane.xlu0 %1318 }
 0x34e   :  { %v1346_v18 = vmul.f32 1.442695, %v1337_v22  ;;  %v1348_v56 = vmul.f32 1.442695, %v1338_v40  ;;  %1458 = vperm.xlu1 %3110, %v957_v14   ;;  %v1325_v60 = vrot.slane %v1319_v49, 1  ;;  %v1326_v16 = vrot.slane %v1319_v49, 2 }
 0x34f   :  { %v1350_v3 = vmul.f32 1.442695, %v1339_v1  ;;  %v1327_v20 = vrot.slane %v1319_v49, 3  ;;  %v1340_v43 = vsub.f32 %v3871_v45, %v1319_v49 }
 0x350   :  { %3160 = vpow2.f32 %v1346_v18  ;;  %v1341_v38 = vsub.f32 %v3862_v29, %v1325_v60  ;;  %v1342_v50 = vsub.f32 %v3864_v19, %v1326_v16 }
 0x351   :  { %3162 = vpow2.f32 %v1348_v56  ;;  %v1343_v42 = vsub.f32 %v3875_v55, %v1327_v20  ;;  %v1352_v0 = vmul.f32 1.442695, %v1340_v43 }
 0x352   :  { %1482 = vperm.xlu1 %3110, %v969_v33   ;;  %3164 = vpow2.f32 %v1344_v34  ;;  %v1354_v2 = vmul.f32 1.442695, %v1341_v38  ;;  %v1356_v13 = vmul.f32 1.442695, %v1342_v50 }
 0x353   :  { %3166 = vpow2.f32 %v1350_v3  ;;  %v1358_v51 = vmul.f32 1.442695, %v1343_v42 }
 0x354   :  { %3168 = vpow2.f32 %v1354_v2 }
 0x355   :  { %3170 = vpow2.f32 %v1356_v13 }
 0x356   :  { %3172 = vpow2.f32 %v1352_v0 }
 0x357   :  { %3174 = vpow2.f32 %v1358_v51 }
 0x35a   :  { %v3919_v59 = vpop.eup %3160 }
 0x35b   :  { %v3921_v12 = vpop.eup %3162  ;;  %v1368_v47 = vrot.slane %v3919_v59, 7 }
 0x35c   :  { %v3925_v29 = vpop.eup %3164  ;;  %v1370_v19 = vrot.slane %v3921_v12, 6 }
 0x35d   :  { %v1369_v45 = vsel %vm646_vm2, %v1368_v47, %v3925_v29  ;;  %v3930_v58 = vpop.eup %3166 }
 0x35e   :  { %v1371_v35 = vsel %vm648_vm3, %v1370_v19, %v1369_v45  ;;  %v1372_v55 = vrot.slane %v3930_v58, 5  ;;  %v3934_v53 = vpop.eup %3168 }
 0x35f   :  { %v3937_v39 = vpop.eup %3170  ;;  %v1374_v44 = vrot.slane %v3934_v53, 7 }
 0x360   :  { %v1373_v9 = vsel %vm650_vm4, %v1372_v55, %v1371_v35  ;;  %v3941_v62 = vpop.eup %3172  ;;  %v1376_v57 = vrot.slane %v3937_v39, 6 }
 0x361   :  { %v1382_v4 = vsel %vm657_vm5, %v1373_v9, 0.0  ;;  %v1375_v52 = vsel %vm646_vm2, %v1374_v44, %v3941_v62  ;;  %v3946_v7 = vpop.eup %3174 }
 0x362   :  { %v1377_v15 = vsel %vm648_vm3, %v1376_v57, %v1375_v52  ;;  %v1378_v10 = vrot.slane %v3946_v7, 5 }
 0x364   :  { %v1379_v27 = vsel %vm650_vm4, %v1378_v10, %v1377_v15 }
 0x365   :  { %v1385_v63 = vsel %vm657_vm5, %v1379_v27, 0.0 }
 0x369   :  { %1383 = vadd.xlane.f32.xlu0 %v1382_v4 }
 0x376   :  { %1386 = vadd.xlane.f32.xlu1 %v1385_v63 }
 0x3b1   :  { %v1438_v8 = vpop.permute.xlu1 %1437  ;;  %v1441_v23 = vpop.permute.xlu0 %1440 }
 0x3b2   :  { %v1487_v48 = vrot.slane %v1438_v8, %v3583_v32  ;;  %v1491_v17 = vrot.slane %v1441_v23, %v3578_v26 }
 0x3b4   :  { %v1492_v49 = vsel %vm581_vm1, %v1491_v17, %v1487_v48 }
 0x3b5   :  { %v1444_v24 = vpop.permute.xlu1 %1443  ;;  %v1462_v25 = vpop.permute.xlu0 %1461 }
 0x3b6   :  { %v1496_v22 = vrot.slane %v1444_v24, %v3583_v32  ;;  %v1523_v50 = vrot.slane %v1462_v25, %v3583_v32 }
 0x3b9   :  { %v1447_v41 = vpop.permute.xlu1 %1446  ;;  %v1468_v31 = vpop.permute.xlu0 %1467 }
 0x3ba   :  { %v1500_v11 = vrot.slane %v1447_v41, %v3578_v26  ;;  %v1532_v60 = vrot.slane %v1468_v31, %v3583_v32 }
 0x3bc   :  { %v1501_v36 = vsel %vm581_vm1, %v1500_v11, %v1496_v22 }
 0x3bd   :  { %v1465_v37 = vpop.permute.xlu1 %1464  ;;  %v1450_v6 = vpop.permute.xlu0 %1449  ;;  %v1556_v38 = vsel %vm646_vm2, %v1501_v36, %v1492_v49  ;;  %v4199_v49 = vld [vmem:[#allocation5_spill] sm:$0xff] }
 0x3be   :  { %v1505_v40 = vrot.slane %v1450_v6, %v3583_v32  ;;  %v1527_v34 = vrot.slane %v1465_v37, %v3578_v26 }
 0x3c0   :  { %v1528_v0 = vsel %vm581_vm1, %v1527_v34, %v1523_v50  ;;  %v4201_v34 = vmov 0.0  }
 0x3c1   :  { %v1471_v28 = vpop.permute.xlu1 %1470  ;;  %v1474_v30 = vpop.permute.xlu0 %1473 }
 0x3c2   :  { %v1536_v14 = vrot.slane %v1471_v28, %v3578_v26  ;;  %v1541_v3 = vrot.slane %v1474_v30, %v3583_v32 }
 0x3c4   :  { %v1537_v20 = vsel %vm581_vm1, %v1536_v14, %v1532_v60 }
 0x3c5   :  { %v1453_v21 = vpop.permute.xlu1 %1452  ;;  %v1456_v46 = vpop.permute.xlu0 %1455  ;;  %v1559_v45 = vsel %vm646_vm2, %v1537_v20, %v1528_v0 }
 0x3c6   :  { %v1509_v5 = vrot.slane %v1453_v21, %v3578_v26  ;;  %v1514_v61 = vrot.slane %v1456_v46, %v3583_v32 }
 0x3c8   :  { %v1510_v1 = vsel %vm581_vm1, %v1509_v5, %v1505_v40 }
 0x3c9   :  { %v1477_v54 = vpop.permute.xlu1 %1476  ;;  %v1480_v16 = vpop.permute.xlu0 %1479  ;;  %v1557_v43 = vsel %vm648_vm3, %v1510_v1, %v1556_v38 }
 0x3ca   :  { %v1545_v18 = vrot.slane %v1477_v54, %v3578_v26  ;;  %v1550_v19 = vrot.slane %v1480_v16, %v3583_v32 }
 0x3cc   :  { %v1546_v13 = vsel %vm581_vm1, %v1545_v18, %v1541_v3 }
 0x3cd   :  { %v1459_v56 = vpop.permute.xlu1 %1458  ;;  %v1560_v55 = vsel %vm648_vm3, %v1546_v13, %v1559_v45 }
 0x3ce   :  { %v1518_v33 = vrot.slane %v1459_v56, %v3578_v26  ;;  %v4200_v56 = vld [vmem:[#allocation6_spill] sm:$0xff] }
 0x3d0   :  { %v1519_v2 = vsel %vm581_vm1, %v1518_v33, %v1514_v61 }
 0x3d1   :  { %v1483_v42 = vpop.permute.xlu1 %1482  ;;  %v1558_v47 = vsel %vm650_vm4, %v1519_v2, %v1557_v43 }
 0x3d2   :  { %v1554_v51 = vrot.slane %v1483_v42, %v3578_v26  ;;  %1564 = vxpose.xlu0.b32.start.end [1/1] (short) (narrow) %v1558_v47, 16 }
 0x3d4   :  { %v1555_v35 = vsel %vm581_vm1, %v1554_v51, %v1550_v19 }
 0x3d5   :  { %v1561_v9 = vsel %vm650_vm4, %v1555_v35, %v1560_v55 }
 0x3d6   :  { %1596 = vxpose.xlu1.b32.start.end [1/1] (short) (narrow) %v1561_v9, 16 }
 0x3f6   :  { %v1384_v4 = vpop.xlane.xlu0 %1383 }
 0x3f7   :  { %v1390_v44 = vrot.slane %v1384_v4, 1  ;;  %v1391_v57 = vrot.slane %v1384_v4, 2  ;;  %v1392_v52 = vrot.slane %v1384_v4, 3 }
 0x3f9   :  { %3176 = vrcp.f32 %v1390_v44 }
 0x3fa   :  { %3178 = vrcp.f32 %v1391_v57 }
 0x3fb   :  { %3180 = vrcp.f32 %v1384_v4 }
 0x3fc   :  { %3182 = vrcp.f32 %v1392_v52 }
 0x403   :  { %v1387_v32 = vpop.xlane.xlu1 %1386  ;;  %v3177_v26 = vpop.eup %3176 }
 0x404   :  { %v1393_v15 = vrot.slane %v1387_v32, 1  ;;  %v1394_v10 = vrot.slane %v1387_v32, 2  ;;  %v1395_v27 = vrot.slane %v1387_v32, 3  ;;  %3184 = vrcp.f32 %v1387_v32  ;;  %v3179_v63 = vpop.eup %3178 }
 0x405   :  { %v1407_v8 = vmul.f32 %v3177_v26, %v3919_v59  ;;  %v3181_v23 = vpop.eup %3180  ;;  %v1409_v24 = vmul.f32 %v3179_v63, %v3921_v12 }
 0x406   :  { %3186 = vrcp.f32 %v1393_v15  ;;  %v3183_v41 = vpop.eup %3182  ;;  %v1405_v31 = vmul.f32 %v3181_v23, %v3925_v29 }
 0x407   :  { %3188 = vrcp.f32 %v1394_v10  ;;  %v2416_v25 = vrot.slane %v1407_v8, 7  ;;  %v2418_v37 = vrot.slane %v1409_v24, 6  ;;  %v1411_v28 = vmul.f32 %v3183_v41, %v3930_v58 }
 0x408   :  { %3190 = vrcp.f32 %v1395_v27 }
 0x409   :  { %v2417_v30 = vsel %vm646_vm2, %v2416_v25, %v1405_v31  ;;  %v2420_v54 = vrot.slane %v1411_v28, 5 }
 0x40a   :  { %v2419_v5 = vsel %vm648_vm3, %v2418_v37, %v2417_v30 }
 0x40b   :  { %v2421_v58 = vsel %vm650_vm4, %v2420_v54, %v2419_v5 }
 0x40e   :  { %v3185_v6 = vpop.eup %3184 }
 0x40f   :  { %v1413_v12 = vmul.f32 %v3185_v6, %v3941_v62 }
 0x410   :  { %v3187_v21 = vpop.eup %3186 }
 0x411   :  { %v3189_v11 = vpop.eup %3188  ;;  %v1415_v48 = vmul.f32 %v3187_v21, %v3934_v53 }
 0x412   :  { %v3191_v59 = vpop.eup %3190  ;;  %v1417_v17 = vmul.f32 %v3189_v11, %v3937_v39  ;;  %v2435_v39 = vrot.slane %v2421_v58, %v4199_v49 }
 0x413   :  { %v2422_v46 = vrot.slane %v1415_v48, 7  ;;  %v1419_v29 = vmul.f32 %v3191_v59, %v3946_v7 }
 0x414   :  { %v2424_v22 = vrot.slane %v1417_v17, 6 }
 0x415   :  { %v2423_v40 = vsel %vm646_vm2, %v2422_v46, %v1413_v12  ;;  %v2426_v36 = vrot.slane %v1419_v29, 5 }
 0x416   :  { %v2425_v14 = vsel %vm648_vm3, %v2424_v22, %v2423_v40 }
 0x417   :  { %v2427_v53 = vsel %vm650_vm4, %v2426_v36, %v2425_v14 }
 0x418   :  { %v2443_v1 = vrot.slane %v2427_v53, %v4199_v49 }
 0x41a   :  { %v2444_v18 = vcombine.low %v2435_v39, %v2443_v1  ;;  %v2445_v62 = vcombine.high %v2435_v39, %v2443_v1 }
 0x41c   :  { %v2452_v7 = vrot.slane %v2444_v18, %v4200_v56  ;;  %v4000_v60 = vrot.slane %v2445_v62, %v4200_v56 }
 0x41e   :  { %3074 = vmatprep.subr.msk.mxu0 %vm2469_vm6, %v2452_v7  ;;  %v2460_v61 = vcombine.high %v2452_v7, %v4201_v34  ;;  %v4010_v33 = vcombine.high %v4000_v60, %v4201_v34 }
 0x41f   :  { %3075 = vmatpush3.msk.msra.mxu0 %vm2469_vm6, %v2452_v7 }
 0x420   :  { %3079 = vmatprep.subr.msk.mxu1 %vm2469_vm6, %v2460_v61  ;;  %3084 = vmatprep.subr.msk.mxu0 %vm2469_vm6, %v4000_v60 }
 0x421   :  { %3080 = vmatpush3.msk.msra.mxu1 %vm2469_vm6, %v2460_v61 }
 0x422   :  { %3089 = vmatprep.subr.msk.mxu1 %vm2469_vm6, %v4010_v33 }
 0x452   :  { %v1580_v3 = vpop.trf.xlu0 }
 0x453   :  { %v1628_v16 = vcombine.high %v1580_v3, %v4201_v34  ;;  %v1635_v38 = vrot.slane %v1580_v3, %v4199_v49 }
 0x455   :  { %v1642_v43 = vrot.slane %v1628_v16, %v4199_v49 }
 0x456   :  { %v1612_v50 = vpop.trf.xlu1  ;;  %v1581_v13 = vpop.trf.xlu0 }
 0x457   :  { %v1643_v20 = vcombine.high %v1612_v50, %v4201_v34  ;;  %v1650_v2 = vrot.slane %v1612_v50, %v4199_v49  ;;  %v1701_v35 = vrot.slane %v1581_v13, %v4199_v49  ;;  %v1694_v44 = vcombine.high %v1581_v13, %v4201_v34 }
 0x459   :  { %v1657_v42 = vrot.slane %v1643_v20, %v4199_v49  ;;  %v1658_v47 = vcombine.low %v1635_v38, %v1650_v2  ;;  %v1659_v19 = vcombine.high %v1635_v38, %v1650_v2  ;;  %v1708_v15 = vrot.slane %v1694_v44, %v4199_v49 }
 0x45a   :  { %v1613_v0 = vpop.trf.xlu1 }
 0x45b   :  { %v1674_v51 = vcombine.low %v1642_v43, %v1657_v42  ;;  %v1666_v45 = vrot.slane %v1658_v47, %v4200_v56  ;;  %v1716_v55 = vrot.slane %v1613_v0, %v4199_v49  ;;  %v1675_v9 = vcombine.high %v1642_v43, %v1657_v42 }
 0x45c   :  { %v1673_v57 = vrot.slane %v1659_v19, %v4200_v56  ;;  %v1709_v52 = vcombine.high %v1613_v0, %v4201_v34 }
 0x45d   :  { %1760 = vxpose.xlu0.b32.start.end [1/1] (short) (narrow) %v1666_v45, 8  ;;  %v1682_v4 = vrot.slane %v1674_v51, %v4200_v56  ;;  %v1724_v32 = vcombine.low %v1701_v35, %v1716_v55  ;;  %v1689_v26 = vrot.slane %v1675_v9, %v4200_v56  ;;  %v1725_v27 = vcombine.high %v1701_v35, %v1716_v55 }
 0x45e   :  { %v1723_v10 = vrot.slane %v1709_v52, %v4199_v49  ;;  %v1690_v63 = vcombine.high %v1666_v45, %v4201_v34  ;;  %v1691_v24 = vcombine.high %v1673_v57, %v4201_v34 }
 0x45f   :  { %1888 = vxpose.xlu1.b32.start.end [1/1] (short) (narrow) %v1682_v4, 8  ;;  %v1732_v8 = vrot.slane %v1724_v32, %v4200_v56  ;;  %v1739_v25 = vrot.slane %v1725_v27, %v4200_v56  ;;  %v1692_v31 = vcombine.high %v1682_v4, %v4201_v34  ;;  %v1693_v6 = vcombine.high %v1689_v26, %v4201_v34 }
 0x460   :  { %v1740_v23 = vcombine.low %v1708_v15, %v1723_v10  ;;  %v1741_v41 = vcombine.high %v1708_v15, %v1723_v10 }
 0x461   :  { %1824 = vxpose.xlu0.b32.start.end [1/1] (short) (narrow) %v1673_v57, 8  ;;  %v1756_v30 = vcombine.high %v1732_v8, %v4201_v34  ;;  %v1757_v21 = vcombine.high %v1739_v25, %v4201_v34 }
 0x462   :  { %v1748_v37 = vrot.slane %v1740_v23, %v4200_v56  ;;  %v1755_v28 = vrot.slane %v1741_v41, %v4200_v56 }
 0x463   :  { %1952 = vxpose.xlu1.b32.start.end [1/1] (short) (narrow) %v1689_v26, 8 }
 0x464   :  { %v1758_v11 = vcombine.high %v1748_v37, %v4201_v34  ;;  %v1759_v48 = vcombine.high %v1755_v28, %v4201_v34 }
 0x465   :  { %1792 = vxpose.xlu0.b32.start.end [1/1] (short) (narrow) %v1690_v63, 8 }
 0x467   :  { %2016 = vxpose.xlu1.b32.start.end [1/1] (short) (narrow) %v1732_v8, 8 }
 0x469   :  { %1856 = vxpose.xlu0.b32.start.end [1/1] (short) (narrow) %v1691_v24, 8 }
 0x46b   :  { %2080 = vxpose.xlu1.b32.start.end [1/1] (short) (narrow) %v1739_v25, 8 }
 0x46d   :  { %1920 = vxpose.xlu0.b32.start.end [1/1] (short) (narrow) %v1692_v31, 8 }
 0x46f   :  { %2144 = vxpose.xlu1.b32.start.end [1/1] (short) (narrow) %v1748_v37, 8 }
 0x471   :  { %1984 = vxpose.xlu0.b32.start.end [1/1] (short) (narrow) %v1693_v6, 8 }
 0x473   :  { %2208 = vxpose.xlu1.b32.start.end [1/1] (short) (narrow) %v1755_v28, 8 }
 0x475   :  { %2048 = vxpose.xlu0.b32.start.end [1/1] (short) (narrow) %v1756_v30, 8 }
 0x479   :  { %2112 = vxpose.xlu0.b32.start.end [1/1] (short) (narrow) %v1757_v21, 8 }
 0x47d   :  { %2176 = vxpose.xlu0.b32.start.end [1/1] (short) (narrow) %v1758_v11, 8 }
 0x481   :  { %2240 = vxpose.xlu0.b32.start.end [1/1] (short) (narrow) %v1759_v48, 8 }
 0x4dd   :  { %v1776_v59 = vpop.trf.xlu0 }
 0x4df   :  { %v1904_v17 = vpop.trf.xlu1 }
 0x4e1   :  { %v1840_v5 = vpop.trf.xlu0 }
 0x4e2   :  { %v2272_v40 = vcombine.low %v1776_v59, %v1840_v5 }
 0x4e3   :  { %v1968_v46 = vpop.trf.xlu1 }
 0x4e4   :  { %v2288_v14 = vcombine.low %v1904_v17, %v1968_v46  ;;  %v2279_v1 = vrot.slane %v2272_v40, %v4199_v49 }
 0x4e5   :  { %v1808_v12 = vpop.trf.xlu0 }
 0x4e6   :  { %v2295_v7 = vrot.slane %v2288_v14, %v4199_v49 }
 0x4e7   :  { %v2032_v54 = vpop.trf.xlu1 }
 0x4e9   :  { %v1872_v29 = vpop.trf.xlu0 }
 0x4ea   :  { %v2280_v22 = vcombine.low %v1808_v12, %v1872_v29 }
 0x4eb   :  { %v2096_v39 = vpop.trf.xlu1 }
 0x4ec   :  { %v2287_v36 = vrot.slane %v2280_v22, %v4199_v49  ;;  %v2340_v19 = vcombine.low %v2032_v54, %v2096_v39 }
 0x4ed   :  { %v1936_v58 = vpop.trf.xlu0 }
 0x4ee   :  { %v2304_v62 = vcombine.low %v2279_v1, %v2287_v36  ;;  %v2347_v55 = vrot.slane %v2340_v19, %v4199_v49  ;;  %v2305_v32 = vcombine.high %v2279_v1, %v2287_v36 }
 0x4ef   :  { %v2160_v38 = vpop.trf.xlu1 }
 0x4f0   :  { %v2312_v50 = vrot.slane %v2304_v62, %v4200_v56  ;;  %v2319_v23 = vrot.slane %v2305_v32, %v4200_v56 }
 0x4f1   :  { %v2000_v53 = vpop.trf.xlu0 }
 0x4f2   :  { %v2296_v18 = vcombine.low %v1936_v58, %v2000_v53 }
 0x4f3   :  { %v2224_v47 = vpop.trf.xlu1 }
 0x4f4   :  { %v2303_v61 = vrot.slane %v2296_v18, %v4199_v49  ;;  %v2356_v45 = vcombine.low %v2160_v38, %v2224_v47 }
 0x4f5   :  { %v2064_v3 = vpop.trf.xlu0 }
 0x4f6   :  { %v2320_v16 = vcombine.low %v2295_v7, %v2303_v61  ;;  %v2321_v4 = vcombine.high %v2295_v7, %v2303_v61  ;;  %v2363_v57 = vrot.slane %v2356_v45, %v4199_v49 }
 0x4f8   :  { %v2328_v20 = vrot.slane %v2320_v16, %v4200_v56  ;;  %v2335_v10 = vrot.slane %v2321_v4, %v4200_v56 }
 0x4f9   :  { %v2128_v2 = vpop.trf.xlu0 }
 0x4fa   :  { %v2336_v43 = vcombine.low %v2312_v50, %v2328_v20  ;;  %v2337_v13 = vcombine.high %v2312_v50, %v2328_v20  ;;  %v2348_v42 = vcombine.low %v2064_v3, %v2128_v2  ;;  %v2338_v37 = vcombine.low %v2319_v23, %v2335_v10 }
 0x4fb   :  { %v2339_v6 = vcombine.high %v2319_v23, %v2335_v10 }
 0x4fc   :  { %3076 = vmatprep.mubr.msk.f32.mxu0 %vm2462_vm7, %v2336_v43  ;;  %3081 = vmatprep.mubr.msk.f32.mxu1 %vm2462_vm7, %v2337_v13  ;;  %v2355_v51 = vrot.slane %v2348_v42, %v4199_v49 }
 0x4fd   :  { %v2192_v0 = vpop.trf.xlu0 }
 0x4fe   :  { %v2372_v44 = vcombine.low %v2347_v55, %v2355_v51  ;;  %v2373_v27 = vcombine.high %v2347_v55, %v2355_v51 }
 0x500   :  { %v2380_v63 = vrot.slane %v2372_v44, %v4200_v56  ;;  %v2387_v31 = vrot.slane %v2373_v27, %v4200_v56 }
 0x501   :  { %v2256_v35 = vpop.trf.xlu0 }
 0x502   :  { %v2364_v9 = vcombine.low %v2192_v0, %v2256_v35 }
 0x504   :  { %v2371_v52 = vrot.slane %v2364_v9, %v4199_v49 }
 0x506   :  { %v2388_v26 = vcombine.low %v2363_v57, %v2371_v52  ;;  %v2389_v15 = vcombine.high %v2363_v57, %v2371_v52 }
 0x508   :  { %v2396_v8 = vrot.slane %v2388_v26, %v4200_v56  ;;  %v2403_v24 = vrot.slane %v2389_v15, %v4200_v56 }
 0x50a   :  { %v2404_v25 = vcombine.low %v2380_v63, %v2396_v8  ;;  %v2405_v41 = vcombine.high %v2380_v63, %v2396_v8  ;;  %v2406_v28 = vcombine.low %v2387_v31, %v2403_v24  ;;  %v2407_v30 = vcombine.high %v2387_v31, %v2403_v24 }
 0x50c   :  { %3077 = vmatmul.mubr.msk.f32.vlgmr.msra.gmra.mrb[0].mxu0 %vm2462_vm7, %v2404_v25  ;;  %3082 = vmatmul.mubr.msk.f32.vlgmr.msra.gmra.mrb[0].mxu1 %vm2462_vm7, %v2405_v41 }
 0x50d   :  { %3085 = vmatpush3.msk.msra.mxu0 %vm2469_vm6, %v4000_v60  ;;  %3090 = vmatpush3.msk.msra.mxu1 %vm2469_vm6, %v4010_v33 }
 0x50e   :  { %3086 = vmatprep.mubr.msk.f32.mxu0 %vm2462_vm7, %v2338_v37  ;;  %3091 = vmatprep.mubr.msk.f32.mxu1 %vm2462_vm7, %v2339_v6 }
 0x510   :  { %3087 = vmatmul.mubr.msk.f32.vlgmr.msra.gmra.mrb[2].mxu0 %vm2462_vm7, %v2406_v28  ;;  %3092 = vmatmul.mubr.msk.f32.vlgmr.msra.gmra.mrb[2].mxu1 %vm2462_vm7, %v2407_v30 }
 0x5df   :  { %v3078_v21 = vpop.f32.mrb[0].mxu0  ;;  %v3083_v11 = vpop.f32.mrb[0].mxu1 }
 0x5e0   :  { %v2539_v48 = vpop.f32.mrb[1].mxu0  ;;  %v2623_v59 = vpop.f32.mrb[1].mxu1  ;;  %v2801_v60 = vmul.f32 100.0, %v3078_v21  ;;  %v2803_v12 = vmul.f32 100.0, %v3083_v11 }
 0x5e1   :  { %v2800_v22 = vmul.f32 100.0, %v2539_v48  ;;  %v2802_v58 = vmul.f32 100.0, %v2623_v59 }
 0x5e3   :  { %v3088_v17 = vpop.f32.mrb[2].mxu0  ;;  %v3093_v5 = vpop.f32.mrb[2].mxu1 }
 0x5e4   :  { %v2805_v46 = vmul.f32 100.0, %v3088_v17  ;;  %v2807_v33 = vmul.f32 100.0, %v3093_v5  ;;  %v2707_v29 = vpop.f32.mrb[3].mxu0  ;;  %v2791_v54 = vpop.f32.mrb[3].mxu1 }
 0x5e5   :  { %v2804_v40 = vmul.f32 100.0, %v2707_v29  ;;  %v2806_v36 = vmul.f32 100.0, %v2791_v54 }
 0x5e6   :  { %v2876_v14 = vcombine.low %v2801_v60, %v2805_v46  ;;  %v2877_v53 = vcombine.high %v2801_v60, %v2805_v46  ;;  %v2892_v39 = vcombine.low %v2803_v12, %v2807_v33  ;;  %v2893_v1 = vcombine.high %v2803_v12, %v2807_v33 }
 0x5e7   :  { %v2808_v18 = vcombine.low %v2800_v22, %v2804_v40  ;;  %v2809_v62 = vcombine.high %v2800_v22, %v2804_v40  ;;  %v2824_v7 = vcombine.low %v2802_v58, %v2806_v36  ;;  %v2825_v61 = vcombine.high %v2802_v58, %v2806_v36 }
 0x5e8   :  { %v2884_v3 = vrot.slane %v2876_v14, %v4199_v49  ;;  %v2891_v16 = vrot.slane %v2877_v53, %v4199_v49  ;;  %v2900_v38 = vrot.slane %v2892_v39, %v4199_v49  ;;  %v2907_v50 = vrot.slane %v2893_v1, %v4199_v49  ;;  %v3020_v1 = vld [vmem:[%s4129_s0] sm:$0xff] }
 0x5e9   :  { %v2816_v20 = vrot.slane %v2808_v18, %v4199_v49  ;;  %v2823_v2 = vrot.slane %v2809_v62, %v4199_v49  ;;  %v2832_v43 = vrot.slane %v2824_v7, %v4199_v49  ;;  %v2839_v13 = vrot.slane %v2825_v61, %v4199_v49  ;;  %v3021_v18 = vld [vmem:[%s4129_s0 + $0x8] sm:$0xff] }
 0x5ea   :  { %v2908_v42 = vcombine.low %v2884_v3, %v2900_v38  ;;  %v2909_v47 = vcombine.high %v2884_v3, %v2900_v38  ;;  %v2924_v0 = vcombine.low %v2891_v16, %v2907_v50  ;;  %v2925_v19 = vcombine.high %v2891_v16, %v2907_v50 }
 0x5eb   :  { %v2840_v51 = vcombine.low %v2816_v20, %v2832_v43  ;;  %v2841_v45 = vcombine.high %v2816_v20, %v2832_v43  ;;  %v2856_v35 = vcombine.low %v2823_v2, %v2839_v13  ;;  %v2857_v55 = vcombine.high %v2823_v2, %v2839_v13 }
 0x5ec   :  { %v2923_v9 = vrot.slane %v2909_v47, %v4200_v56  ;;  %v2932_v44 = vrot.slane %v2924_v0, %v4200_v56  ;;  %v2916_v49 = vrot.slane %v2908_v42, %v4200_v56  ;;  %v2939_v52 = vrot.slane %v2925_v19, %v4200_v56 }
 0x5ed   :  { %v2864_v4 = vrot.slane %v2856_v35, %v4200_v56  ;;  %v2871_v57 = vrot.slane %v2857_v55, %v4200_v56  ;;  %v2855_v26 = vrot.slane %v2841_v45, %v4200_v56  ;;  %v2848_v63 = vrot.slane %v2840_v51, %v4200_v56 }
 0x5ee   :  { %2977 = vrot.lane.b32.xlu1 %v2923_v9, %s3221_s21  ;;  %v2940_v32 = vcombine.high %v2916_v49, %v4201_v34  ;;  %v2941_v10 = vcombine.high %v2923_v9, %v4201_v34  ;;  %v2942_v8 = vcombine.high %v2932_v44, %v4201_v34  ;;  %v2943_v25 = vcombine.high %v2939_v52, %v4201_v34 }
 0x5ef   :  { %2957 = vrot.lane.b32.xlu0 %v2864_v4, %s3219_s19  ;;  %v2874_v15 = vcombine.high %v2864_v4, %v4201_v34  ;;  %v2875_v27 = vcombine.high %v2871_v57, %v4201_v34  ;;  %v2872_v23 = vcombine.high %v2848_v63, %v4201_v34  ;;  %v2873_v24 = vcombine.high %v2855_v26, %v4201_v34 }
 0x5f2   :  { %2985 = vrot.lane.b32.xlu1 %v2932_v44, %s3219_s19  ;;  %s3229_s19 = smov [#allocation2]  }
 0x5f3   :  { %2965 = vrot.lane.b32.xlu0 %v2871_v57, %s3216_s14 }
 0x5f6   :  { %2993 = vrot.lane.b32.xlu1 %v2939_v52, %s3216_s14 }
 0x5f7   :  { %2973 = vrot.lane.b32.xlu0 %v2940_v32, %s3222_s22 }
 0x5fa   :  { %2949 = vrot.lane.b32.xlu1 %v2855_v26, %s3221_s21 }
 0x5fb   :  { %2961 = vrot.lane.b32.xlu0 %v2874_v15, %s3218_s18 }
 0x5fe   :  { %2981 = vrot.lane.b32.xlu1 %v2941_v10, %s3220_s20 }
 0x5ff   :  { %2969 = vrot.lane.b32.xlu0 %v2875_v27, %s3217_s15 }
 0x602   :  { %2989 = vrot.lane.b32.xlu1 %v2942_v8, %s3218_s18 }
 0x606   :  { %2945 = vrot.lane.b32.xlu1 %v2872_v23, %s3222_s22 }
 0x60a   :  { %2953 = vrot.lane.b32.xlu1 %v2873_v24, %s3220_s20  ;;  %s3035_s20 = sshll.u32 %s3229_s19, 4  ;;  %s3036_s20 = int_to_ptr.vmem [resolvable:$true] %s3035_s20 }
 0x60b   :  { %s3192_s21 = scalar_lea.vmem %s3036_s20, 256  ;;  %p3197_p1 = scmp.lt.s32.totalorder %s3036_s20, %s3036_s20 }
 0x60c   :  { %p3193_p0 = scmp.ne.s32.totalorder %s3036_s20, %s3192_s21  ;;  %p3198_p2 = scmp.lt.s32.totalorder %s3192_s21, %s3192_s21 }
 0x60e   :  { %2997 = vrot.lane.b32.xlu1 %v2943_v25, %s3217_s15  ;;  %p3199_p3 = por %p3198_p2, %p3197_p1 }
 0x610   :  { %p3200_p4 = pnand %p3199_p3, %p3193_p0 }
 0x660   :  { %v2978_v41 = vpop.permute.xlu1 %2977 }
 0x661   :  { %v2958_v37 = vpop.permute.xlu0 %2957 }
 0x664   :  { %v2986_v31 = vpop.permute.xlu1 %2985 }
 0x665   :  { %v2966_v6 = vpop.permute.xlu0 %2965 }
 0x668   :  { %v2994_v56 = vpop.permute.xlu1 %2993 }
 0x669   :  { %v2974_v21 = vpop.permute.xlu0 %2973 }
 0x66a   :  { %v3013_v48 = vsel %vm505_vm0, %v2916_v49, %v2974_v21 }
 0x66b   :  { %v3014_v59 = vsel %vm3001_vm8, %v3013_v48, %v2978_v41 }
 0x66c   :  { %v2950_v28 = vpop.permute.xlu1 %2949 }
 0x66d   :  { %v2962_v60 = vpop.permute.xlu0 %2961 }
 0x670   :  { %v2982_v30 = vpop.permute.xlu1 %2981 }
 0x671   :  { %v3015_v5 = vsel %vm3003_vm9, %v3014_v59, %v2982_v30  ;;  %v2970_v40 = vpop.permute.xlu0 %2969 }
 0x672   :  { %v3016_v12 = vsel %vm3005_vm10, %v3015_v5, %v2986_v31 }
 0x674   :  { %v2990_v11 = vpop.permute.xlu1 %2989 }
 0x675   :  { %v3017_v29 = vsel %vm3007_vm11, %v3016_v12, %v2990_v11 }
 0x676   :  { %v3018_v14 = vsel %vm3009_vm12, %v3017_v29, %v2994_v56 }
 0x678   :  { %v2946_v17 = vpop.permute.xlu1 %2945 }
 0x679   :  { %v3000_v34 = vsel %vm505_vm0, %v2848_v63, %v2946_v17 }
 0x67a   :  { %v3002_v46 = vsel %vm3001_vm8, %v3000_v34, %v2950_v28 }
 0x67c   :  { %v2954_v33 = vpop.permute.xlu1 %2953 }
 0x67d   :  { %v3004_v54 = vsel %vm3003_vm9, %v3002_v46, %v2954_v33 }
 0x67e   :  { %v3006_v22 = vsel %vm3005_vm10, %v3004_v54, %v2958_v37 }
 0x67f   :  { %v3008_v58 = vsel %vm3007_vm11, %v3006_v22, %v2962_v60 }
 0x680   :  { %v3010_v36 = vsel %vm3009_vm12, %v3008_v58, %v2966_v6  ;;  %v2998_v53 = vpop.permute.xlu1 %2997 }
 0x681   :  { %v3012_v39 = vsel %vm3011_vm13, %v3010_v36, %v2970_v40  ;;  %v3019_v62 = vsel %vm3011_vm13, %v3018_v14, %v2998_v53 }
 0x682   :  { %v3024_v7 = vcombine.low %v3012_v39, %v3019_v62 }
 0x684   :  { %v3026_v61 = vmul.f32 %v3024_v7, %v3020_v1  ;;  %v3027_v3 = vmul.f32 %v3024_v7, %v3021_v18 }
 0x686   :  { %3028 = vst [vmem:[#allocation2] sm:$0xff] %v3026_v61  ;;  %3029 = vst [vmem:[#allocation2 + $0x8] sm:$0xff] %v3027_v3 }
 0x687   :  { %3203 = shalt.err (!%p3200_p4)
}
 0x688   :  { %s3204_s0 = scalar_lea.hbm %s4132_s3, 256 }
 0x689   :  { %p3205_p5 = scmp.ne.s32.totalorder %s4132_s3, %s3204_s0  ;;  %p3208_p6 = scmp.lt.u32.totalorder %s3204_s0, %s4132_s3 }
 0x68b   :  { %p3210_p7 = pnand %p3208_p6, %p3205_p5 }
 0x68d   :  { %3213 = shalt.err (!%p3210_p7)
}
 0x68e   :  { %s3230_s1 = smov 128   ;;  %s3231_s4 = smov 8  }
 0x68f   :  { %3041 = dma.vmem_to_hbm [thread:$0]  %s3036_s20, 256, %s4132_s3, [#allocation3], %s3230_s1, %s3230_s1, %s3231_s4  }
 0x690   :  { %3214 = dma.done.wait [#allocation3], 256  }
 0x691   :  { %3215 = vsyncadd [#allocation3], 4294967040 }
 0x692   :  { %3045 = vsyncpa [#allocation3], 1 }

</bundles_post_ra>
